<compile_context>
chip_gen: v6e
topology: v6e:2x2x1
jax: 0.10.0
libtpu: 0.0.40
codegen_flags: <defaults>
</compile_context>

<pallas_src>
import functools

import numpy as np
import jax
import jax.numpy as jnp
from jax import lax
from jax.experimental import pallas as pl
from jax.experimental.pallas import tpu as pltpu

EPS = 1e-5
HIGH = jax.lax.Precision.HIGHEST   # used only by the plain-JAX reference


# ----------------------------- Pallas kernels -------------------------------

def _deconv_bn_relu_kernel(x_ref, scale_ref, shift_ref, w_ref, o_ref):
    """relu(ConvTranspose2d(bn0(x))) for one batch element, all phases in one dot.

    x_ref:       (1, Cin, Hd*Wd)
    scale/shift: (Cin, 1)             folded BatchNorm2d
    w_ref:       (Cout*s0*s1, Cin)    rows ordered (d, p, q)
    o_ref:       (1, Cout*s0*s1, Hd*Wd)
    """
    a = x_ref[0] * scale_ref[...] + shift_ref[...]                   # (Cin, HWd)
    y = jnp.dot(w_ref[...], a, preferred_element_type=jnp.float32)    # (M2, HWd)
    o_ref[0] = jnp.maximum(y, 0.0)


def _fused_blocks_kernel(KH, KW, Wp, C,
                         u_ref, skip_ref, mask_ref,
                         b2_s0_ref, b2_h0_ref, b2_w1_ref, b2_s1_ref, b2_h1_ref,
                         b2_w2_ref, b2_wsu_ref, b2_wss_ref, b2_bs_ref,
                         r_s0_ref, r_h0_ref, r_w1_ref, r_s1_ref, r_h1_ref,
                         r_w2_ref,
                         o_ref, strip_ref):
    """conv_block2 .. conv_block5 for one batch element, entirely in VMEM.

    Activations are (C, P) with P = flat padded spatial (multiple of 128 lanes).
    Valid outputs only ever read strip columns whose sources lie inside the
    padded grid, so roll wrap-around / lane-pad tail values only land in halo
    positions, which are re-zeroed by the mask before every conv and sliced
    away by the wrapper at the end.
    """
    P = u_ref.shape[-1]
    ph, pw = KH // 2, KW // 2
    KC = KH * KW * C
    mask = mask_ref[...]          # (1, P) float 0/1: 1 on the valid interior

    def bn_relu_mask(x, s, h):
        # folded-BN affine + ReLU, then force the halo (and lane-pad tail) to 0
        return jnp.maximum(x * s + h, 0.0) * mask

    def fill_strip(a, row_off):
        # im2col along the sublane axis: KH*KW lane-rolled copies of `a` (C, P).
        # Roll shift for tap (i, j) is the flat-spatial offset of that tap.
        for i in range(KH):
            for j in range(KW):
                sh = (i - ph) * Wp + (j - pw)
                rolled = a if sh == 0 else pltpu.roll(a, shift=(-sh) % P, axis=1)
                strip_ref[pl.ds(row_off + (i * KW + j) * C, C), :] = rolled

    def conv_same(a, wmat):       # single C-channel input group
        fill_strip(a, 0)
        return jnp.dot(wmat, strip_ref[pl.ds(0, KC), :],
                       preferred_element_type=jnp.float32)

    u = u_ref[0]        # (C, P) upsampled half of the concat (raw, pre-bn)
    skip = skip_ref[0]  # (C, P) skip half of the concat (raw, pre-bn)

    # ---- block2: input = concat(u, skip) on channels, 1x1-conv shortcut -----
    a_u = bn_relu_mask(u, b2_s0_ref[pl.ds(0, C), :], b2_h0_ref[pl.ds(0, C), :])
    a_s = bn_relu_mask(skip, b2_s0_ref[pl.ds(C, C), :], b2_h0_ref[pl.ds(C, C), :])
    fill_strip(a_u, 0)
    fill_strip(a_s, KC)
    h1 = jnp.dot(b2_w1_ref[...], strip_ref[...],
                 preferred_element_type=jnp.float32)                  # (C, P)
    a1 = bn_relu_mask(h1, b2_s1_ref[...], b2_h1_ref[...])
    y1 = conv_same(a1, b2_w2_ref[...])
    res = (jnp.dot(b2_wsu_ref[...], u, preferred_element_type=jnp.float32)
           + jnp.dot(b2_wss_ref[...], skip, preferred_element_type=jnp.float32)
           + b2_bs_ref[...])
    x = res + y1

    # ---- blocks 3..5 (identity residual), fori_loop bounds live ranges ------
    def body(k, xc):
        a = bn_relu_mask(xc, r_s0_ref[k], r_h0_ref[k])
        h = conv_same(a, r_w1_ref[k])
        a2 = bn_relu_mask(h, r_s1_ref[k], r_h1_ref[k])
        y = conv_same(a2, r_w2_ref[k])
        return xc + y

    x = lax.fori_loop(0, 3, body, x)
    o_ref[0] = x


# ------------------------------ Pallas wrappers ------------------------------

def deconv_bn_relu(x, scale, shift, wt):
    """relu(ConvTranspose2d(bn0(x))), kernel_size == stride, padding 0.

    x: (B, Cin, Hd, Wd) NCHW.  Returns u: (B, Cout, Hd*s0, Wd*s1) NCHW.
    The kernel outputs the matmul-natural (B, Cout*s0*s1, Hd*Wd) layout; the
    pixel shuffle is a single XLA transpose over the small upsampled tensor.
    """
    B, Cin, Hd, Wd = x.shape
    _, Cout, s0, s1 = wt.shape
    HWd = Hd * Wd
    M2 = Cout * s0 * s1
    # torch ConvTranspose2d weight (Cin, Cout, s0, s1) -> rows ordered (d, p, q)
    wr = jnp.transpose(wt, (1, 2, 3, 0)).reshape(M2, Cin).astype(jnp.float32)

    y = pl.pallas_call(
        _deconv_bn_relu_kernel,
        out_shape=jax.ShapeDtypeStruct((B, M2, HWd), jnp.float32),
        grid=(B,),
        in_specs=[
            pl.BlockSpec((1, Cin, HWd), lambda b: (b, 0, 0)),
            pl.BlockSpec((Cin, 1), lambda b: (0, 0)),
            pl.BlockSpec((Cin, 1), lambda b: (0, 0)),
            pl.BlockSpec((M2, Cin), lambda b: (0, 0)),
        ],
        out_specs=pl.BlockSpec((1, M2, HWd), lambda b: (b, 0, 0)),
        compiler_params=pltpu.CompilerParams(dimension_semantics=("parallel",)),
    )(x.reshape(B, Cin, HWd), scale.reshape(Cin, 1), shift.reshape(Cin, 1), wr)

    # pixel shuffle: (B, Cout, s0, s1, Hd, Wd) -> (B, Cout, Hd, s0, Wd, s1)
    u = y.reshape(B, Cout, s0, s1, Hd, Wd)
    u = jnp.transpose(u, (0, 1, 4, 2, 5, 3)).reshape(B, Cout, Hd * s0, Wd * s1)
    return u


def _im2col_w(w):
    """(Cout, Cin, KH, KW) OIHW -> (Cout, KH*KW*Cin), matching the strip rows."""
    o, i, kh, kw = w.shape
    return jnp.transpose(w, (0, 2, 3, 1)).reshape(o, kh * kw * i).astype(jnp.float32)


def fused_conv_blocks(u_pad, skip_pad, mask, prm, Wp):
    """conv_block2 .. conv_block5 in a single pallas_call (grid over batch)."""
    B, C, PF = u_pad.shape
    b2 = prm['block2']
    KH, KW = b2['w1'].shape[2], b2['w1'].shape[3]
    assert KH % 2 == 1 and KW % 2 == 1
    KC = KH * KW * C

    # block2 parameters, split along the concat's input-channel axis
    b2_s0 = b2['s0'].reshape(2 * C, 1)
    b2_h0 = b2['b0'].reshape(2 * C, 1)
    w1 = b2['w1']
    b2_w1 = jnp.concatenate([_im2col_w(w1[:, :C]), _im2col_w(w1[:, C:])], axis=1)
    b2_s1 = b2['s1'].reshape(C, 1)
    b2_h1 = b2['b1'].reshape(C, 1)
    b2_w2 = _im2col_w(b2['w2'])
    b2_wsu = b2['ws'][:, :C, 0, 0].astype(jnp.float32)   # acts on upsampled half
    b2_wss = b2['ws'][:, C:, 0, 0].astype(jnp.float32)   # acts on skip half
    b2_bs = b2['bs'].reshape(C, 1)

    rest = [prm[n] for n in ('block3', 'block4', 'block5')]
    r_s0 = jnp.stack([p['s0'].reshape(C, 1) for p in rest])        # (3, C, 1)
    r_h0 = jnp.stack([p['b0'].reshape(C, 1) for p in rest])
    r_w1 = jnp.stack([_im2col_w(p['w1']) for p in rest])           # (3, C, KC)
    r_s1 = jnp.stack([p['s1'].reshape(C, 1) for p in rest])
    r_h1 = jnp.stack([p['b1'].reshape(C, 1) for p in rest])
    r_w2 = jnp.stack([_im2col_w(p['w2']) for p in rest])

    def full(shape):   # whole-array block, shared across grid steps
        return pl.BlockSpec(shape, lambda b, _n=len(shape): (0,) * _n)

    in_specs = [
        pl.BlockSpec((1, C, PF), lambda b: (b, 0, 0)),   # u (padded flat)
        pl.BlockSpec((1, C, PF), lambda b: (b, 0, 0)),   # skip (padded flat)
        full((1, PF)),                                   # halo mask
        full((2 * C, 1)), full((2 * C, 1)), full((C, 2 * KC)),
        full((C, 1)), full((C, 1)), full((C, KC)),
        full((C, C)), full((C, C)), full((C, 1)),
        full((3, C, 1)), full((3, C, 1)), full((3, C, KC)),
        full((3, C, 1)), full((3, C, 1)), full((3, C, KC)),
    ]

    return pl.pallas_call(
        functools.partial(_fused_blocks_kernel, KH, KW, Wp, C),
        out_shape=jax.ShapeDtypeStruct((B, C, PF), jnp.float32),
        grid=(B,),
        in_specs=in_specs,
        out_specs=pl.BlockSpec((1, C, PF), lambda b: (b, 0, 0)),
        scratch_shapes=[pltpu.VMEM((2 * KC, PF), jnp.float32)],   # im2col strip
        compiler_params=pltpu.CompilerParams(
            dimension_semantics=("parallel",),
            vmem_limit_bytes=64 * 1024 * 1024),
    )(u_pad, skip_pad, mask,
      b2_s0, b2_h0, b2_w1, b2_s1, b2_h1, b2_w2, b2_wsu, b2_wss, b2_bs,
      r_s0, r_h0, r_w1, r_s1, r_h1, r_w2)


def decoder_block_res4b(x_nchw, concat_nchw, P):
    """Pallas forward of DecoderBlockRes4B.  Inputs / outputs are NCHW."""
    x = x_nchw.astype(jnp.float32)
    skip = concat_nchw.astype(jnp.float32)
    B, Cin, Hd, Wd = x.shape
    _, Cout, s0, s1 = P['wt'].shape
    H, W = Hd * s0, Wd * s1
    KH, KW = P['block2']['w1'].shape[2], P['block2']['w1'].shape[3]
    ph, pw = KH // 2, KW // 2
    Hp, Wp = H + 2 * ph, W + 2 * pw
    PF = ((Hp * Wp + 127) // 128) * 128       # lane-dense flat padded length

    # bn0 + ConvTranspose2d + ReLU (Pallas), pixel-shuffled to NCHW by XLA.
    u = deconv_bn_relu(x, P['bn0_scale'], P['bn0_shift'], P['wt'])

    def to_flat(t):   # (B, Cout, H, W) -> (B, Cout, PF) zero-padded flat grid
        tp = jnp.pad(t, ((0, 0), (0, 0), (ph, ph), (pw, pw)))
        tp = tp.reshape(B, Cout, Hp * Wp)
        return jnp.pad(tp, ((0, 0), (0, 0), (0, PF - Hp * Wp)))

    u_pad = to_flat(u)
    skip_pad = to_flat(skip)

    m2d = jnp.zeros((Hp, Wp), jnp.float32).at[ph:ph + H, pw:pw + W].set(1.0)
    mask = jnp.zeros((1, PF), jnp.float32).at[0, :Hp * Wp].set(m2d.reshape(-1))

    y = fused_conv_blocks(u_pad, skip_pad, mask, P, Wp)       # (B, Cout, PF)
    y = y[:, :, :Hp * Wp].reshape(B, Cout, Hp, Wp)
    return y[:, :, ph:ph + H, pw:pw + W]                      # NCHW


# ---------------------- deterministic parameter creation ---------------------

def _fold_bn(key, c):
    k1, k2, k3, k4 = jax.random.split(key, 4)
    gamma = 1.0 + 0.1 * jax.random.normal(k1, (c,), jnp.float32)
    beta = 0.1 * jax.random.normal(k2, (c,), jnp.float32)
    mean = 0.1 * jax.random.normal(k3, (c,), jnp.float32)
    var = jnp.abs(1.0 + 0.1 * jax.random.normal(k4, (c,), jnp.float32))
    scale = gamma / jnp.sqrt(var + EPS)
    shift = beta - mean * scale
    return scale, shift


def _make_block_params(key, cin, cout, ks):
    keys = jax.random.split(key, 6)
    p = {}
    p['s0'], p['b0'] = _fold_bn(keys[0], cin)
    p['w1'] = 0.1 * jax.random.normal(keys[1], (cout, cin, ks[0], ks[1]), jnp.float32)
    p['s1'], p['b1'] = _fold_bn(keys[2], cout)
    p['w2'] = 0.1 * jax.random.normal(keys[3], (cout, cout, ks[0], ks[1]), jnp.float32)
    if cin != cout:  # 1x1 shortcut conv (with bias), as in ConvBlockRes
        p['ws'] = 0.1 * jax.random.normal(keys[4], (cout, cin, 1, 1), jnp.float32)
        p['bs'] = 0.1 * jax.random.normal(keys[5], (cout,), jnp.float32)
    return p


def make_params(key, cin, cout, ks, up):
    keys = jax.random.split(key, 6)
    P = {}
    P['bn0_scale'], P['bn0_shift'] = _fold_bn(keys[0], cin)
    P['wt'] = 0.1 * jax.random.normal(keys[1], (cin, cout, up[0], up[1]), jnp.float32)
    P['block2'] = _make_block_params(keys[2], 2 * cout, cout, ks)
    P['block3'] = _make_block_params(keys[3], cout, cout, ks)
    P['block4'] = _make_block_params(keys[4], cout, cout, ks)
    P['block5'] = _make_block_params(keys[5], cout, cout, ks)
    return P


# ------------------------- plain-JAX reference (NCHW) ------------------------

def _conv2d_nchw(x, w, pad):
    return jax.lax.conv_general_dilated(
        x, w, window_strides=(1, 1),
        padding=((pad[0], pad[0]), (pad[1], pad[1])),
        dimension_numbers=('NCHW', 'OIHW', 'NCHW'),
        precision=HIGH)


def _ref_block(x, p):
    kh, kw = p['w1'].shape[2], p['w1'].shape[3]
    a1 = jnp.maximum(x * p['s0'][None, :, None, None] + p['b0'][None, :, None, None], 0.0)
    h = _conv2d_nchw(a1, p['w1'], (kh // 2, kw // 2))
    a2 = jnp.maximum(h * p['s1'][None, :, None, None] + p['b1'][None, :, None, None], 0.0)
    y = _conv2d_nchw(a2, p['w2'], (kh // 2, kw // 2))
    if 'ws' in p:
        res = _conv2d_nchw(x, p['ws'], (0, 0)) + p['bs'][None, :, None, None]
    else:
        res = x
    return res + y


def ref_decoder_block(x, skip, P):
    a = x * P['bn0_scale'][None, :, None, None] + P['bn0_shift'][None, :, None, None]
    # ConvTranspose2d with kernel == stride, padding 0:
    #   out[b,d,h*s0+p,w*s1+q] = sum_c a[b,c,h,w] * W[c,d,p,q]
    y = jnp.einsum('bchw,cdpq->bdhpwq', a, P['wt'], precision=HIGH)
    B, Co, Hd, s0, Wd, s1 = y.shape
    y = y.reshape(B, Co, Hd * s0, Wd * s1)
    y = jnp.maximum(y, 0.0)
    y = jnp.concatenate([y, skip], axis=1)
    for name in ('block2', 'block3', 'block4', 'block5'):
        y = _ref_block(y, P[name])
    return y


# ----------------------------------- main ------------------------------------

if __name__ == "__main__":
    B, Ci, Co = 2, 16, 8
    Hd, Wd = 8, 8
    ks = (3, 3)
    up = (2, 2)

    key = jax.random.PRNGKey(0)
    kx, kc, kp = jax.random.split(key, 3)
    # input_tensor:  (B, in_channels, downsampled_time, downsampled_freq)
    x = jax.random.normal(kx, (B, Ci, Hd, Wd), jnp.float32)
    # concat_tensor: (B, out_channels, time, freq)
    skip = jax.random.normal(kc, (B, Co, Hd * up[0], Wd * up[1]), jnp.float32)
    P = make_params(kp, Ci, Co, ks, up)

    fwd = jax.jit(decoder_block_res4b)
    out = jax.block_until_ready(fwd(x, skip, P))
    ref = jax.block_until_ready(ref_decoder_block(x, skip, P))

    assert out.shape == (B, Co, Hd * up[0], Wd * up[1])
    np.testing.assert_allclose(np.asarray(out), np.asarray(ref), rtol=3e-2, atol=3e-2)
    print("KERNEL_OK")
</pallas_src>

<mosaic_0001>
module attributes {stable_mosaic.version = 11 : i64} {
  func.func @_deconv_bn_relu_kernel(%arg0: i32, %arg1: memref<1x16x64xf32, #tpu.memory_space<vmem>>, %arg2: memref<16x1xf32, #tpu.memory_space<vmem>>, %arg3: memref<16x1xf32, #tpu.memory_space<vmem>>, %arg4: memref<32x16xf32, #tpu.memory_space<vmem>>, %arg5: memref<1x32x64xf32, #tpu.memory_space<vmem>>) attributes {dimension_semantics = [#tpu.dimension_semantics<parallel>], iteration_bounds = array<i64: 2>, scalar_prefetch = 0 : i64, scratch_operands = 0 : i64, tpu.core_type = #tpu.core_type<tc>, window_params = [{transform_indices = @transform_0, window_bounds = array<i64: 1, 16, 64>}, {pipeline_mode = #tpu.pipeline_mode<synchronous>, transform_indices = @transform_1, window_bounds = array<i64: 16, 1>}, {pipeline_mode = #tpu.pipeline_mode<synchronous>, transform_indices = @transform_2, window_bounds = array<i64: 16, 1>}, {pipeline_mode = #tpu.pipeline_mode<synchronous>, transform_indices = @transform_3, window_bounds = array<i64: 32, 16>}, {transform_indices = @transform_4, window_bounds = array<i64: 1, 32, 64>}]} {
    %c0 = arith.constant 0 : index
    %c0_0 = arith.constant 0 : index
    %c0_1 = arith.constant 0 : index
    %0 = vector.load %arg1[%c0, %c0_0, %c0_1] : memref<1x16x64xf32, #tpu.memory_space<vmem>>, vector<1x16x64xf32>
    %1 = vector.shape_cast %0 : vector<1x16x64xf32> to vector<16x64xf32>
    %c0_2 = arith.constant 0 : index
    %c0_3 = arith.constant 0 : index
    %2 = vector.load %arg2[%c0_2, %c0_3] : memref<16x1xf32, #tpu.memory_space<vmem>>, vector<16x1xf32>
    %3 = vector.broadcast %2 : vector<16x1xf32> to vector<16x64xf32>
    %4 = arith.mulf %1, %3 : vector<16x64xf32>
    %c0_4 = arith.constant 0 : index
    %c0_5 = arith.constant 0 : index
    %5 = vector.load %arg3[%c0_4, %c0_5] : memref<16x1xf32, #tpu.memory_space<vmem>>, vector<16x1xf32>
    %6 = vector.broadcast %5 : vector<16x1xf32> to vector<16x64xf32>
    %7 = arith.addf %4, %6 : vector<16x64xf32>
    %c0_6 = arith.constant 0 : index
    %c0_7 = arith.constant 0 : index
    %8 = vector.load %arg4[%c0_6, %c0_7] : memref<32x16xf32, #tpu.memory_space<vmem>>, vector<32x16xf32>
    %cst = arith.constant dense<0.000000e+00> : vector<32x64xf32>
    %9 = tpu.matmul %8, %7, %cst {dimension_numbers = #tpu.dot_dimension_numbers<[1], [0], [0], [1], [0, 0, 1, 1], [], []>} : vector<32x16xf32>, vector<16x64xf32>, vector<32x64xf32> -> vector<32x64xf32>
    %cst_8 = arith.constant 0.000000e+00 : f32
    %10 = vector.broadcast %cst_8 : f32 to vector<32x64xf32>
    %11 = arith.maximumf %9, %10 : vector<32x64xf32>
    %c0_9 = arith.constant 0 : index
    %c0_10 = arith.constant 0 : index
    %c0_11 = arith.constant 0 : index
    %12 = vector.load %arg5[%c0_9, %c0_10, %c0_11] : memref<1x32x64xf32, #tpu.memory_space<vmem>>, vector<1x32x64xf32>
    %13 = vector.shape_cast %12 : vector<1x32x64xf32> to vector<32x64xf32>
    %14 = vector.shape_cast %11 : vector<32x64xf32> to vector<1x32x64xf32>
    tpu.vector_store %arg5[%c0_9, %c0_10, %c0_11], %14 {strides = array<i32>} : memref<1x32x64xf32, #tpu.memory_space<vmem>>, vector<1x32x64xf32>,
    return
  }
  func.func @transform_0(%arg0: i32) -> (i32, i32, i32) {
    %c0_i32 = arith.constant 0 : i32
    %c0_i32_0 = arith.constant 0 : i32
    %c0_i32_1 = arith.constant 0 : i32
    return %arg0, %c0_i32, %c0_i32_0 : i32, i32, i32
  }
  func.func @transform_1(%arg0: i32) -> (i32, i32) {
    %c0_i32 = arith.constant 0 : i32
    %c0_i32_0 = arith.constant 0 : i32
    %c0_i32_1 = arith.constant 0 : i32
    return %c0_i32, %c0_i32_0 : i32, i32
  }
  func.func @transform_2(%arg0: i32) -> (i32, i32) {
    %c0_i32 = arith.constant 0 : i32
    %c0_i32_0 = arith.constant 0 : i32
    %c0_i32_1 = arith.constant 0 : i32
    return %c0_i32, %c0_i32_0 : i32, i32
  }
  func.func @transform_3(%arg0: i32) -> (i32, i32) {
    %c0_i32 = arith.constant 0 : i32
    %c0_i32_0 = arith.constant 0 : i32
    %c0_i32_1 = arith.constant 0 : i32
    return %c0_i32, %c0_i32_0 : i32, i32
  }
  func.func @transform_4(%arg0: i32) -> (i32, i32, i32) {
    %c0_i32 = arith.constant 0 : i32
    %c0_i32_0 = arith.constant 0 : i32
    %c0_i32_1 = arith.constant 0 : i32
    return %arg0, %c0_i32, %c0_i32_0 : i32, i32, i32
  }
}

module attributes {stable_mosaic.version = 11 : i64} {
  func.func @_fused_blocks_kernel(%arg0: i32, %arg1: memref<1x8x384xf32, #tpu.memory_space<vmem>>, %arg2: memref<1x8x384xf32, #tpu.memory_space<vmem>>, %arg3: memref<1x384xf32, #tpu.memory_space<vmem>>, %arg4: memref<16x1xf32, #tpu.memory_space<vmem>>, %arg5: memref<16x1xf32, #tpu.memory_space<vmem>>, %arg6: memref<8x144xf32, #tpu.memory_space<vmem>>, %arg7: memref<8x1xf32, #tpu.memory_space<vmem>>, %arg8: memref<8x1xf32, #tpu.memory_space<vmem>>, %arg9: memref<8x72xf32, #tpu.memory_space<vmem>>, %arg10: memref<8x8xf32, #tpu.memory_space<vmem>>, %arg11: memref<8x8xf32, #tpu.memory_space<vmem>>, %arg12: memref<8x1xf32, #tpu.memory_space<vmem>>, %arg13: memref<3x8x1xf32, #tpu.memory_space<vmem>>, %arg14: memref<3x8x1xf32, #tpu.memory_space<vmem>>, %arg15: memref<3x8x72xf32, #tpu.memory_space<vmem>>, %arg16: memref<3x8x1xf32, #tpu.memory_space<vmem>>, %arg17: memref<3x8x1xf32, #tpu.memory_space<vmem>>, %arg18: memref<3x8x72xf32, #tpu.memory_space<vmem>>, %arg19: memref<1x8x384xf32, #tpu.memory_space<vmem>>, %arg20: memref<144x384xf32, #tpu.memory_space<vmem>>) attributes {dimension_semantics = [#tpu.dimension_semantics<parallel>], iteration_bounds = array<i64: 2>, scalar_prefetch = 0 : i64, scratch_operands = 1 : i64, tpu.core_type = #tpu.core_type<tc>, window_params = [{transform_indices = @transform_0, window_bounds = array<i64: 1, 8, 384>}, {transform_indices = @transform_1, window_bounds = array<i64: 1, 8, 384>}, {pipeline_mode = #tpu.pipeline_mode<synchronous>, transform_indices = @transform_2, window_bounds = array<i64: 1, 384>}, {pipeline_mode = #tpu.pipeline_mode<synchronous>, transform_indices = @transform_3, window_bounds = array<i64: 16, 1>}, {pipeline_mode = #tpu.pipeline_mode<synchronous>, transform_indices = @transform_4, window_bounds = array<i64: 16, 1>}, {pipeline_mode = #tpu.pipeline_mode<synchronous>, transform_indices = @transform_5, window_bounds = array<i64: 8, 144>}, {pipeline_mode = #tpu.pipeline_mode<synchronous>, transform_indices = @transform_6, window_bounds = array<i64: 8, 1>}, {pipeline_mode = #tpu.pipeline_mode<synchronous>, transform_indices = @transform_7, window_bounds = array<i64: 8, 1>}, {pipeline_mode = #tpu.pipeline_mode<synchronous>, transform_indices = @transform_8, window_bounds = array<i64: 8, 72>}, {pipeline_mode = #tpu.pipeline_mode<synchronous>, transform_indices = @transform_9, window_bounds = array<i64: 8, 8>}, {pipeline_mode = #tpu.pipeline_mode<synchronous>, transform_indices = @transform_10, window_bounds = array<i64: 8, 8>}, {pipeline_mode = #tpu.pipeline_mode<synchronous>, transform_indices = @transform_11, window_bounds = array<i64: 8, 1>}, {pipeline_mode = #tpu.pipeline_mode<synchronous>, transform_indices = @transform_12, window_bounds = array<i64: 3, 8, 1>}, {pipeline_mode = #tpu.pipeline_mode<synchronous>, transform_indices = @transform_13, window_bounds = array<i64: 3, 8, 1>}, {pipeline_mode = #tpu.pipeline_mode<synchronous>, transform_indices = @transform_14, window_bounds = array<i64: 3, 8, 72>}, {pipeline_mode = #tpu.pipeline_mode<synchronous>, transform_indices = @transform_15, window_bounds = array<i64: 3, 8, 1>}, {pipeline_mode = #tpu.pipeline_mode<synchronous>, transform_indices = @transform_16, window_bounds = array<i64: 3, 8, 1>}, {pipeline_mode = #tpu.pipeline_mode<synchronous>, transform_indices = @transform_17, window_bounds = array<i64: 3, 8, 72>}, {transform_indices = @transform_18, window_bounds = array<i64: 1, 8, 384>}]} {
    %c0 = arith.constant 0 : index
    %c0_0 = arith.constant 0 : index
    %0 = vector.load %arg3[%c0, %c0_0] : memref<1x384xf32, #tpu.memory_space<vmem>>, vector<1x384xf32>
    %c0_1 = arith.constant 0 : index
    %c0_2 = arith.constant 0 : index
    %c0_3 = arith.constant 0 : index
    %1 = vector.load %arg1[%c0_1, %c0_2, %c0_3] : memref<1x8x384xf32, #tpu.memory_space<vmem>>, vector<1x8x384xf32>
    %2 = vector.shape_cast %1 : vector<1x8x384xf32> to vector<8x384xf32>
    %c0_4 = arith.constant 0 : index
    %c0_5 = arith.constant 0 : index
    %c0_6 = arith.constant 0 : index
    %3 = vector.load %arg2[%c0_4, %c0_5, %c0_6] : memref<1x8x384xf32, #tpu.memory_space<vmem>>, vector<1x8x384xf32>
    %4 = vector.shape_cast %3 : vector<1x8x384xf32> to vector<8x384xf32>
    %c0_7 = arith.constant 0 : index
    %c0_8 = arith.constant 0 : index
    %5 = vector.load %arg4[%c0_7, %c0_8] : memref<16x1xf32, #tpu.memory_space<vmem>>, vector<8x1xf32>
    %c0_9 = arith.constant 0 : index
    %c0_10 = arith.constant 0 : index
    %6 = vector.load %arg5[%c0_9, %c0_10] : memref<16x1xf32, #tpu.memory_space<vmem>>, vector<8x1xf32>
    %7 = vector.broadcast %5 : vector<8x1xf32> to vector<8x384xf32>
    %8 = arith.mulf %2, %7 : vector<8x384xf32>
    %9 = vector.broadcast %6 : vector<8x1xf32> to vector<8x384xf32>
    %10 = arith.addf %8, %9 : vector<8x384xf32>
    %cst = arith.constant 0.000000e+00 : f32
    %11 = vector.broadcast %cst : f32 to vector<8x384xf32>
    %12 = arith.maximumf %10, %11 : vector<8x384xf32>
    %13 = vector.broadcast %0 : vector<1x384xf32> to vector<8x384xf32>
    %14 = arith.mulf %12, %13 : vector<8x384xf32>
    %c8 = arith.constant 8 : index
    %c0_11 = arith.constant 0 : index
    %15 = vector.load %arg4[%c8, %c0_11] : memref<16x1xf32, #tpu.memory_space<vmem>>, vector<8x1xf32>
    %c8_12 = arith.constant 8 : index
    %c0_13 = arith.constant 0 : index
    %16 = vector.load %arg5[%c8_12, %c0_13] : memref<16x1xf32, #tpu.memory_space<vmem>>, vector<8x1xf32>
    %17 = vector.broadcast %15 : vector<8x1xf32> to vector<8x384xf32>
    %18 = arith.mulf %4, %17 : vector<8x384xf32>
    %19 = vector.broadcast %16 : vector<8x1xf32> to vector<8x384xf32>
    %20 = arith.addf %18, %19 : vector<8x384xf32>
    %cst_14 = arith.constant 0.000000e+00 : f32
    %21 = vector.broadcast %cst_14 : f32 to vector<8x384xf32>
    %22 = arith.maximumf %20, %21 : vector<8x384xf32>
    %23 = vector.broadcast %0 : vector<1x384xf32> to vector<8x384xf32>
    %24 = arith.mulf %22, %23 : vector<8x384xf32>
    %c19_i32 = arith.constant 19 : i32
    %25 = tpu.dynamic_rotate %14 by %c19_i32 dim 1 : vector<8x384xf32>, i32 -> vector<8x384xf32>
    %c0_15 = arith.constant 0 : index
    %c0_16 = arith.constant 0 : index
    %26 = vector.load %arg20[%c0_15, %c0_16] : memref<144x384xf32, #tpu.memory_space<vmem>>, vector<8x384xf32>
    tpu.vector_store %arg20[%c0_15, %c0_16], %25 {strides = array<i32>} : memref<144x384xf32, #tpu.memory_space<vmem>>, vector<8x384xf32>,
    %c18_i32 = arith.constant 18 : i32
    %27 = tpu.dynamic_rotate %14 by %c18_i32 dim 1 : vector<8x384xf32>, i32 -> vector<8x384xf32>
    %c8_17 = arith.constant 8 : index
    %c0_18 = arith.constant 0 : index
    %28 = vector.load %arg20[%c8_17, %c0_18] : memref<144x384xf32, #tpu.memory_space<vmem>>, vector<8x384xf32>
    tpu.vector_store %arg20[%c8_17, %c0_18], %27 {strides = array<i32>} : memref<144x384xf32, #tpu.memory_space<vmem>>, vector<8x384xf32>,
    %c17_i32 = arith.constant 17 : i32
    %29 = tpu.dynamic_rotate %14 by %c17_i32 dim 1 : vector<8x384xf32>, i32 -> vector<8x384xf32>
    %c16 = arith.constant 16 : index
    %c0_19 = arith.constant 0 : index
    %30 = vector.load %arg20[%c16, %c0_19] : memref<144x384xf32, #tpu.memory_space<vmem>>, vector<8x384xf32>
    tpu.vector_store %arg20[%c16, %c0_19], %29 {strides = array<i32>} : memref<144x384xf32, #tpu.memory_space<vmem>>, vector<8x384xf32>,
    %c1_i32 = arith.constant 1 : i32
    %31 = tpu.dynamic_rotate %14 by %c1_i32 dim 1 : vector<8x384xf32>, i32 -> vector<8x384xf32>
    %c24 = arith.constant 24 : index
    %c0_20 = arith.constant 0 : index
    %32 = vector.load %arg20[%c24, %c0_20] : memref<144x384xf32, #tpu.memory_space<vmem>>, vector<8x384xf32>
    tpu.vector_store %arg20[%c24, %c0_20], %31 {strides = array<i32>} : memref<144x384xf32, #tpu.memory_space<vmem>>, vector<8x384xf32>,
    %c32 = arith.constant 32 : index
    %c0_21 = arith.constant 0 : index
    %33 = vector.load %arg20[%c32, %c0_21] : memref<144x384xf32, #tpu.memory_space<vmem>>, vector<8x384xf32>
    tpu.vector_store %arg20[%c32, %c0_21], %14 {strides = array<i32>} : memref<144x384xf32, #tpu.memory_space<vmem>>, vector<8x384xf32>,
    %c383_i32 = arith.constant 383 : i32
    %34 = tpu.dynamic_rotate %14 by %c383_i32 dim 1 : vector<8x384xf32>, i32 -> vector<8x384xf32>
    %c40 = arith.constant 40 : index
    %c0_22 = arith.constant 0 : index
    %35 = vector.load %arg20[%c40, %c0_22] : memref<144x384xf32, #tpu.memory_space<vmem>>, vector<8x384xf32>
    tpu.vector_store %arg20[%c40, %c0_22], %34 {strides = array<i32>} : memref<144x384xf32, #tpu.memory_space<vmem>>, vector<8x384xf32>,
    %c367_i32 = arith.constant 367 : i32
    %36 = tpu.dynamic_rotate %14 by %c367_i32 dim 1 : vector<8x384xf32>, i32 -> vector<8x384xf32>
    %c48 = arith.constant 48 : index
    %c0_23 = arith.constant 0 : index
    %37 = vector.load %arg20[%c48, %c0_23] : memref<144x384xf32, #tpu.memory_space<vmem>>, vector<8x384xf32>
    tpu.vector_store %arg20[%c48, %c0_23], %36 {strides = array<i32>} : memref<144x384xf32, #tpu.memory_space<vmem>>, vector<8x384xf32>,
    %c366_i32 = arith.constant 366 : i32
    %38 = tpu.dynamic_rotate %14 by %c366_i32 dim 1 : vector<8x384xf32>, i32 -> vector<8x384xf32>
    %c56 = arith.constant 56 : index
    %c0_24 = arith.constant 0 : index
    %39 = vector.load %arg20[%c56, %c0_24] : memref<144x384xf32, #tpu.memory_space<vmem>>, vector<8x384xf32>
    tpu.vector_store %arg20[%c56, %c0_24], %38 {strides = array<i32>} : memref<144x384xf32, #tpu.memory_space<vmem>>, vector<8x384xf32>,
    %c365_i32 = arith.constant 365 : i32
    %40 = tpu.dynamic_rotate %14 by %c365_i32 dim 1 : vector<8x384xf32>, i32 -> vector<8x384xf32>
    %c64 = arith.constant 64 : index
    %c0_25 = arith.constant 0 : index
    %41 = vector.load %arg20[%c64, %c0_25] : memref<144x384xf32, #tpu.memory_space<vmem>>, vector<8x384xf32>
    tpu.vector_store %arg20[%c64, %c0_25], %40 {strides = array<i32>} : memref<144x384xf32, #tpu.memory_space<vmem>>, vector<8x384xf32>,
    %c19_i32_26 = arith.constant 19 : i32
    %42 = tpu.dynamic_rotate %24 by %c19_i32_26 dim 1 : vector<8x384xf32>, i32 -> vector<8x384xf32>
    %c72 = arith.constant 72 : index
    %c0_27 = arith.constant 0 : index
    %43 = vector.load %arg20[%c72, %c0_27] : memref<144x384xf32, #tpu.memory_space<vmem>>, vector<8x384xf32>
    tpu.vector_store %arg20[%c72, %c0_27], %42 {strides = array<i32>} : memref<144x384xf32, #tpu.memory_space<vmem>>, vector<8x384xf32>,
    %c18_i32_28 = arith.constant 18 : i32
    %44 = tpu.dynamic_rotate %24 by %c18_i32_28 dim 1 : vector<8x384xf32>, i32 -> vector<8x384xf32>
    %c80 = arith.constant 80 : index
    %c0_29 = arith.constant 0 : index
    %45 = vector.load %arg20[%c80, %c0_29] : memref<144x384xf32, #tpu.memory_space<vmem>>, vector<8x384xf32>
    tpu.vector_store %arg20[%c80, %c0_29], %44 {strides = array<i32>} : memref<144x384xf32, #tpu.memory_space<vmem>>, vector<8x384xf32>,
    %c17_i32_30 = arith.constant 17 : i32
    %46 = tpu.dynamic_rotate %24 by %c17_i32_30 dim 1 : vector<8x384xf32>, i32 -> vector<8x384xf32>
    %c88 = arith.constant 88 : index
    %c0_31 = arith.constant 0 : index
    %47 = vector.load %arg20[%c88, %c0_31] : memref<144x384xf32, #tpu.memory_space<vmem>>, vector<8x384xf32>
    tpu.vector_store %arg20[%c88, %c0_31], %46 {strides = array<i32>} : memref<144x384xf32, #tpu.memory_space<vmem>>, vector<8x384xf32>,
    %c1_i32_32 = arith.constant 1 : i32
    %48 = tpu.dynamic_rotate %24 by %c1_i32_32 dim 1 : vector<8x384xf32>, i32 -> vector<8x384xf32>
    %c96 = arith.constant 96 : index
    %c0_33 = arith.constant 0 : index
    %49 = vector.load %arg20[%c96, %c0_33] : memref<144x384xf32, #tpu.memory_space<vmem>>, vector<8x384xf32>
    tpu.vector_store %arg20[%c96, %c0_33], %48 {strides = array<i32>} : memref<144x384xf32, #tpu.memory_space<vmem>>, vector<8x384xf32>,
    %c104 = arith.constant 104 : index
    %c0_34 = arith.constant 0 : index
    %50 = vector.load %arg20[%c104, %c0_34] : memref<144x384xf32, #tpu.memory_space<vmem>>, vector<8x384xf32>
    tpu.vector_store %arg20[%c104, %c0_34], %24 {strides = array<i32>} : memref<144x384xf32, #tpu.memory_space<vmem>>, vector<8x384xf32>,
    %c383_i32_35 = arith.constant 383 : i32
    %51 = tpu.dynamic_rotate %24 by %c383_i32_35 dim 1 : vector<8x384xf32>, i32 -> vector<8x384xf32>
    %c112 = arith.constant 112 : index
    %c0_36 = arith.constant 0 : index
    %52 = vector.load %arg20[%c112, %c0_36] : memref<144x384xf32, #tpu.memory_space<vmem>>, vector<8x384xf32>
    tpu.vector_store %arg20[%c112, %c0_36], %51 {strides = array<i32>} : memref<144x384xf32, #tpu.memory_space<vmem>>, vector<8x384xf32>,
    %c367_i32_37 = arith.constant 367 : i32
    %53 = tpu.dynamic_rotate %24 by %c367_i32_37 dim 1 : vector<8x384xf32>, i32 -> vector<8x384xf32>
    %c120 = arith.constant 120 : index
    %c0_38 = arith.constant 0 : index
    %54 = vector.load %arg20[%c120, %c0_38] : memref<144x384xf32, #tpu.memory_space<vmem>>, vector<8x384xf32>
    tpu.vector_store %arg20[%c120, %c0_38], %53 {strides = array<i32>} : memref<144x384xf32, #tpu.memory_space<vmem>>, vector<8x384xf32>,
    %c366_i32_39 = arith.constant 366 : i32
    %55 = tpu.dynamic_rotate %24 by %c366_i32_39 dim 1 : vector<8x384xf32>, i32 -> vector<8x384xf32>
    %c128 = arith.constant 128 : index
    %c0_40 = arith.constant 0 : index
    %56 = vector.load %arg20[%c128, %c0_40] : memref<144x384xf32, #tpu.memory_space<vmem>>, vector<8x384xf32>
    tpu.vector_store %arg20[%c128, %c0_40], %55 {strides = array<i32>} : memref<144x384xf32, #tpu.memory_space<vmem>>, vector<8x384xf32>,
    %c365_i32_41 = arith.constant 365 : i32
    %57 = tpu.dynamic_rotate %24 by %c365_i32_41 dim 1 : vector<8x384xf32>, i32 -> vector<8x384xf32>
    %c136 = arith.constant 136 : index
    %c0_42 = arith.constant 0 : index
    %58 = vector.load %arg20[%c136, %c0_42] : memref<144x384xf32, #tpu.memory_space<vmem>>, vector<8x384xf32>
    tpu.vector_store %arg20[%c136, %c0_42], %57 {strides = array<i32>} : memref<144x384xf32, #tpu.memory_space<vmem>>, vector<8x384xf32>,
    %c0_43 = arith.constant 0 : index
    %c0_44 = arith.constant 0 : index
    %59 = vector.load %arg6[%c0_43, %c0_44] : memref<8x144xf32, #tpu.memory_space<vmem>>, vector<8x144xf32>
    %c0_45 = arith.constant 0 : index
    %c0_46 = arith.constant 0 : index
    %60 = vector.load %arg20[%c0_45, %c0_46] : memref<144x384xf32, #tpu.memory_space<vmem>>, vector<144x384xf32>
    %cst_47 = arith.constant dense<0.000000e+00> : vector<8x384xf32>
    %61 = tpu.matmul %59, %60, %cst_47 {dimension_numbers = #tpu.dot_dimension_numbers<[1], [0], [0], [1], [0, 0, 1, 1], [], []>} : vector<8x144xf32>, vector<144x384xf32>, vector<8x384xf32> -> vector<8x384xf32>
    %c0_48 = arith.constant 0 : index
    %c0_49 = arith.constant 0 : index
    %62 = vector.load %arg7[%c0_48, %c0_49] : memref<8x1xf32, #tpu.memory_space<vmem>>, vector<8x1xf32>
    %c0_50 = arith.constant 0 : index
    %c0_51 = arith.constant 0 : index
    %63 = vector.load %arg8[%c0_50, %c0_51] : memref<8x1xf32, #tpu.memory_space<vmem>>, vector<8x1xf32>
    %64 = vector.broadcast %62 : vector<8x1xf32> to vector<8x384xf32>
    %65 = arith.mulf %61, %64 : vector<8x384xf32>
    %66 = vector.broadcast %63 : vector<8x1xf32> to vector<8x384xf32>
    %67 = arith.addf %65, %66 : vector<8x384xf32>
    %cst_52 = arith.constant 0.000000e+00 : f32
    %68 = vector.broadcast %cst_52 : f32 to vector<8x384xf32>
    %69 = arith.maximumf %67, %68 : vector<8x384xf32>
    %70 = vector.broadcast %0 : vector<1x384xf32> to vector<8x384xf32>
    %71 = arith.mulf %69, %70 : vector<8x384xf32>
    %c0_53 = arith.constant 0 : index
    %c0_54 = arith.constant 0 : index
    %72 = vector.load %arg9[%c0_53, %c0_54] : memref<8x72xf32, #tpu.memory_space<vmem>>, vector<8x72xf32>
    %c19_i32_55 = arith.constant 19 : i32
    %73 = tpu.dynamic_rotate %71 by %c19_i32_55 dim 1 : vector<8x384xf32>, i32 -> vector<8x384xf32>
    %c0_56 = arith.constant 0 : index
    %c0_57 = arith.constant 0 : index
    %74 = vector.load %arg20[%c0_56, %c0_57] : memref<144x384xf32, #tpu.memory_space<vmem>>, vector<8x384xf32>
    tpu.vector_store %arg20[%c0_56, %c0_57], %73 {strides = array<i32>} : memref<144x384xf32, #tpu.memory_space<vmem>>, vector<8x384xf32>,
    %c18_i32_58 = arith.constant 18 : i32
    %75 = tpu.dynamic_rotate %71 by %c18_i32_58 dim 1 : vector<8x384xf32>, i32 -> vector<8x384xf32>
    %c8_59 = arith.constant 8 : index
    %c0_60 = arith.constant 0 : index
    %76 = vector.load %arg20[%c8_59, %c0_60] : memref<144x384xf32, #tpu.memory_space<vmem>>, vector<8x384xf32>
    tpu.vector_store %arg20[%c8_59, %c0_60], %75 {strides = array<i32>} : memref<144x384xf32, #tpu.memory_space<vmem>>, vector<8x384xf32>,
    %c17_i32_61 = arith.constant 17 : i32
    %77 = tpu.dynamic_rotate %71 by %c17_i32_61 dim 1 : vector<8x384xf32>, i32 -> vector<8x384xf32>
    %c16_62 = arith.constant 16 : index
    %c0_63 = arith.constant 0 : index
    %78 = vector.load %arg20[%c16_62, %c0_63] : memref<144x384xf32, #tpu.memory_space<vmem>>, vector<8x384xf32>
    tpu.vector_store %arg20[%c16_62, %c0_63], %77 {strides = array<i32>} : memref<144x384xf32, #tpu.memory_space<vmem>>, vector<8x384xf32>,
    %c1_i32_64 = arith.constant 1 : i32
    %79 = tpu.dynamic_rotate %71 by %c1_i32_64 dim 1 : vector<8x384xf32>, i32 -> vector<8x384xf32>
    %c24_65 = arith.constant 24 : index
    %c0_66 = arith.constant 0 : index
    %80 = vector.load %arg20[%c24_65, %c0_66] : memref<144x384xf32, #tpu.memory_space<vmem>>, vector<8x384xf32>
    tpu.vector_store %arg20[%c24_65, %c0_66], %79 {strides = array<i32>} : memref<144x384xf32, #tpu.memory_space<vmem>>, vector<8x384xf32>,
    %c32_67 = arith.constant 32 : index
    %c0_68 = arith.constant 0 : index
    %81 = vector.load %arg20[%c32_67, %c0_68] : memref<144x384xf32, #tpu.memory_space<vmem>>, vector<8x384xf32>
    tpu.vector_store %arg20[%c32_67, %c0_68], %71 {strides = array<i32>} : memref<144x384xf32, #tpu.memory_space<vmem>>, vector<8x384xf32>,
    %c383_i32_69 = arith.constant 383 : i32
    %82 = tpu.dynamic_rotate %71 by %c383_i32_69 dim 1 : vector<8x384xf32>, i32 -> vector<8x384xf32>
    %c40_70 = arith.constant 40 : index
    %c0_71 = arith.constant 0 : index
    %83 = vector.load %arg20[%c40_70, %c0_71] : memref<144x384xf32, #tpu.memory_space<vmem>>, vector<8x384xf32>
    tpu.vector_store %arg20[%c40_70, %c0_71], %82 {strides = array<i32>} : memref<144x384xf32, #tpu.memory_space<vmem>>, vector<8x384xf32>,
    %c367_i32_72 = arith.constant 367 : i32
    %84 = tpu.dynamic_rotate %71 by %c367_i32_72 dim 1 : vector<8x384xf32>, i32 -> vector<8x384xf32>
    %c48_73 = arith.constant 48 : index
    %c0_74 = arith.constant 0 : index
    %85 = vector.load %arg20[%c48_73, %c0_74] : memref<144x384xf32, #tpu.memory_space<vmem>>, vector<8x384xf32>
    tpu.vector_store %arg20[%c48_73, %c0_74], %84 {strides = array<i32>} : memref<144x384xf32, #tpu.memory_space<vmem>>, vector<8x384xf32>,
    %c366_i32_75 = arith.constant 366 : i32
    %86 = tpu.dynamic_rotate %71 by %c366_i32_75 dim 1 : vector<8x384xf32>, i32 -> vector<8x384xf32>
    %c56_76 = arith.constant 56 : index
    %c0_77 = arith.constant 0 : index
    %87 = vector.load %arg20[%c56_76, %c0_77] : memref<144x384xf32, #tpu.memory_space<vmem>>, vector<8x384xf32>
    tpu.vector_store %arg20[%c56_76, %c0_77], %86 {strides = array<i32>} : memref<144x384xf32, #tpu.memory_space<vmem>>, vector<8x384xf32>,
    %c365_i32_78 = arith.constant 365 : i32
    %88 = tpu.dynamic_rotate %71 by %c365_i32_78 dim 1 : vector<8x384xf32>, i32 -> vector<8x384xf32>
    %c64_79 = arith.constant 64 : index
    %c0_80 = arith.constant 0 : index
    %89 = vector.load %arg20[%c64_79, %c0_80] : memref<144x384xf32, #tpu.memory_space<vmem>>, vector<8x384xf32>
    tpu.vector_store %arg20[%c64_79, %c0_80], %88 {strides = array<i32>} : memref<144x384xf32, #tpu.memory_space<vmem>>, vector<8x384xf32>,
    %c0_81 = arith.constant 0 : index
    %c0_82 = arith.constant 0 : index
    %90 = vector.load %arg20[%c0_81, %c0_82] : memref<144x384xf32, #tpu.memory_space<vmem>>, vector<72x384xf32>
    %cst_83 = arith.constant dense<0.000000e+00> : vector<8x384xf32>
    %91 = tpu.matmul %72, %90, %cst_83 {dimension_numbers = #tpu.dot_dimension_numbers<[1], [0], [0], [1], [0, 0, 1, 1], [], []>} : vector<8x72xf32>, vector<72x384xf32>, vector<8x384xf32> -> vector<8x384xf32>
    %c0_84 = arith.constant 0 : index
    %c0_85 = arith.constant 0 : index
    %92 = vector.load %arg10[%c0_84, %c0_85] : memref<8x8xf32, #tpu.memory_space<vmem>>, vector<8x8xf32>
    %cst_86 = arith.constant dense<0.000000e+00> : vector<8x384xf32>
    %93 = tpu.matmul %92, %2, %cst_86 {dimension_numbers = #tpu.dot_dimension_numbers<[1], [0], [0], [1], [0, 0, 1, 1], [], []>} : vector<8x8xf32>, vector<8x384xf32>, vector<8x384xf32> -> vector<8x384xf32>
    %c0_87 = arith.constant 0 : index
    %c0_88 = arith.constant 0 : index
    %94 = vector.load %arg11[%c0_87, %c0_88] : memref<8x8xf32, #tpu.memory_space<vmem>>, vector<8x8xf32>
    %cst_89 = arith.constant dense<0.000000e+00> : vector<8x384xf32>
    %95 = tpu.matmul %94, %4, %cst_89 {dimension_numbers = #tpu.dot_dimension_numbers<[1], [0], [0], [1], [0, 0, 1, 1], [], []>} : vector<8x8xf32>, vector<8x384xf32>, vector<8x384xf32> -> vector<8x384xf32>
    %96 = arith.addf %93, %95 : vector<8x384xf32>
    %c0_90 = arith.constant 0 : index
    %c0_91 = arith.constant 0 : index
    %97 = vector.load %arg12[%c0_90, %c0_91] : memref<8x1xf32, #tpu.memory_space<vmem>>, vector<8x1xf32>
    %98 = vector.broadcast %97 : vector<8x1xf32> to vector<8x384xf32>
    %99 = arith.addf %96, %98 : vector<8x384xf32>
    %100 = arith.addf %99, %91 : vector<8x384xf32>
    %c0_i32 = arith.constant 0 : i32
    %c3_i32 = arith.constant 3 : i32
    %101 = arith.addi %c0_i32, %c3_i32 : i32
    %c1_i32_92 = arith.constant 1 : i32
    %102 = scf.for %arg21 = %c0_i32 to %101 step %c1_i32_92 iter_args(%arg22 = %100) -> (vector<8x384xf32>)  : i32 {
      %106 = arith.index_cast %arg21 : i32 to index
      %c0_97 = arith.constant 0 : index
      %c0_98 = arith.constant 0 : index
      %107 = vector.load %arg13[%106, %c0_97, %c0_98] : memref<3x8x1xf32, #tpu.memory_space<vmem>>, vector<1x8x1xf32>
      %108 = vector.shape_cast %107 : vector<1x8x1xf32> to vector<8x1xf32>
      %109 = arith.index_cast %arg21 : i32 to index
      %c0_99 = arith.constant 0 : index
      %c0_100 = arith.constant 0 : index
      %110 = vector.load %arg14[%109, %c0_99, %c0_100] : memref<3x8x1xf32, #tpu.memory_space<vmem>>, vector<1x8x1xf32>
      %111 = vector.shape_cast %110 : vector<1x8x1xf32> to vector<8x1xf32>
      %112 = vector.broadcast %108 : vector<8x1xf32> to vector<8x384xf32>
      %113 = arith.mulf %arg22, %112 : vector<8x384xf32>
      %114 = vector.broadcast %111 : vector<8x1xf32> to vector<8x384xf32>
      %115 = arith.addf %113, %114 : vector<8x384xf32>
      %cst_101 = arith.constant 0.000000e+00 : f32
      %116 = vector.broadcast %cst_101 : f32 to vector<8x384xf32>
      %117 = arith.maximumf %115, %116 : vector<8x384xf32>
      %118 = vector.broadcast %0 : vector<1x384xf32> to vector<8x384xf32>
      %119 = arith.mulf %117, %118 : vector<8x384xf32>
      %120 = arith.index_cast %arg21 : i32 to index
      %c0_102 = arith.constant 0 : index
      %c0_103 = arith.constant 0 : index
      %121 = vector.load %arg15[%120, %c0_102, %c0_103] : memref<3x8x72xf32, #tpu.memory_space<vmem>>, vector<1x8x72xf32>
      %122 = vector.shape_cast %121 : vector<1x8x72xf32> to vector<8x72xf32>
      %c19_i32_104 = arith.constant 19 : i32
      %123 = tpu.dynamic_rotate %119 by %c19_i32_104 dim 1 : vector<8x384xf32>, i32 -> vector<8x384xf32>
      %c0_105 = arith.constant 0 : index
      %c0_106 = arith.constant 0 : index
      %124 = vector.load %arg20[%c0_105, %c0_106] : memref<144x384xf32, #tpu.memory_space<vmem>>, vector<8x384xf32>
      tpu.vector_store %arg20[%c0_105, %c0_106], %123 {strides = array<i32>} : memref<144x384xf32, #tpu.memory_space<vmem>>, vector<8x384xf32>,
      %c18_i32_107 = arith.constant 18 : i32
      %125 = tpu.dynamic_rotate %119 by %c18_i32_107 dim 1 : vector<8x384xf32>, i32 -> vector<8x384xf32>
      %c8_108 = arith.constant 8 : index
      %c0_109 = arith.constant 0 : index
      %126 = vector.load %arg20[%c8_108, %c0_109] : memref<144x384xf32, #tpu.memory_space<vmem>>, vector<8x384xf32>
      tpu.vector_store %arg20[%c8_108, %c0_109], %125 {strides = array<i32>} : memref<144x384xf32, #tpu.memory_space<vmem>>, vector<8x384xf32>,
      %c17_i32_110 = arith.constant 17 : i32
      %127 = tpu.dynamic_rotate %119 by %c17_i32_110 dim 1 : vector<8x384xf32>, i32 -> vector<8x384xf32>
      %c16_111 = arith.constant 16 : index
      %c0_112 = arith.constant 0 : index
      %128 = vector.load %arg20[%c16_111, %c0_112] : memref<144x384xf32, #tpu.memory_space<vmem>>, vector<8x384xf32>
      tpu.vector_store %arg20[%c16_111, %c0_112], %127 {strides = array<i32>} : memref<144x384xf32, #tpu.memory_space<vmem>>, vector<8x384xf32>,
      %c1_i32_113 = arith.constant 1 : i32
      %129 = tpu.dynamic_rotate %119 by %c1_i32_113 dim 1 : vector<8x384xf32>, i32 -> vector<8x384xf32>
      %c24_114 = arith.constant 24 : index
      %c0_115 = arith.constant 0 : index
      %130 = vector.load %arg20[%c24_114, %c0_115] : memref<144x384xf32, #tpu.memory_space<vmem>>, vector<8x384xf32>
      tpu.vector_store %arg20[%c24_114, %c0_115], %129 {strides = array<i32>} : memref<144x384xf32, #tpu.memory_space<vmem>>, vector<8x384xf32>,
      %c32_116 = arith.constant 32 : index
      %c0_117 = arith.constant 0 : index
      %131 = vector.load %arg20[%c32_116, %c0_117] : memref<144x384xf32, #tpu.memory_space<vmem>>, vector<8x384xf32>
      tpu.vector_store %arg20[%c32_116, %c0_117], %119 {strides = array<i32>} : memref<144x384xf32, #tpu.memory_space<vmem>>, vector<8x384xf32>,
      %c383_i32_118 = arith.constant 383 : i32
      %132 = tpu.dynamic_rotate %119 by %c383_i32_118 dim 1 : vector<8x384xf32>, i32 -> vector<8x384xf32>
      %c40_119 = arith.constant 40 : index
      %c0_120 = arith.constant 0 : index
      %133 = vector.load %arg20[%c40_119, %c0_120] : memref<144x384xf32, #tpu.memory_space<vmem>>, vector<8x384xf32>
      tpu.vector_store %arg20[%c40_119, %c0_120], %132 {strides = array<i32>} : memref<144x384xf32, #tpu.memory_space<vmem>>, vector<8x384xf32>,
      %c367_i32_121 = arith.constant 367 : i32
      %134 = tpu.dynamic_rotate %119 by %c367_i32_121 dim 1 : vector<8x384xf32>, i32 -> vector<8x384xf32>
      %c48_122 = arith.constant 48 : index
      %c0_123 = arith.constant 0 : index
      %135 = vector.load %arg20[%c48_122, %c0_123] : memref<144x384xf32, #tpu.memory_space<vmem>>, vector<8x384xf32>
      tpu.vector_store %arg20[%c48_122, %c0_123], %134 {strides = array<i32>} : memref<144x384xf32, #tpu.memory_space<vmem>>, vector<8x384xf32>,
      %c366_i32_124 = arith.constant 366 : i32
      %136 = tpu.dynamic_rotate %119 by %c366_i32_124 dim 1 : vector<8x384xf32>, i32 -> vector<8x384xf32>
      %c56_125 = arith.constant 56 : index
      %c0_126 = arith.constant 0 : index
      %137 = vector.load %arg20[%c56_125, %c0_126] : memref<144x384xf32, #tpu.memory_space<vmem>>, vector<8x384xf32>
      tpu.vector_store %arg20[%c56_125, %c0_126], %136 {strides = array<i32>} : memref<144x384xf32, #tpu.memory_space<vmem>>, vector<8x384xf32>,
      %c365_i32_127 = arith.constant 365 : i32
      %138 = tpu.dynamic_rotate %119 by %c365_i32_127 dim 1 : vector<8x384xf32>, i32 -> vector<8x384xf32>
      %c64_128 = arith.constant 64 : index
      %c0_129 = arith.constant 0 : index
      %139 = vector.load %arg20[%c64_128, %c0_129] : memref<144x384xf32, #tpu.memory_space<vmem>>, vector<8x384xf32>
      tpu.vector_store %arg20[%c64_128, %c0_129], %138 {strides = array<i32>} : memref<144x384xf32, #tpu.memory_space<vmem>>, vector<8x384xf32>,
      %c0_130 = arith.constant 0 : index
      %c0_131 = arith.constant 0 : index
      %140 = vector.load %arg20[%c0_130, %c0_131] : memref<144x384xf32, #tpu.memory_space<vmem>>, vector<72x384xf32>
      %cst_132 = arith.constant dense<0.000000e+00> : vector<8x384xf32>
      %141 = tpu.matmul %122, %140, %cst_132 {dimension_numbers = #tpu.dot_dimension_numbers<[1], [0], [0], [1], [0, 0, 1, 1], [], []>} : vector<8x72xf32>, vector<72x384xf32>, vector<8x384xf32> -> vector<8x384xf32>
      %142 = arith.index_cast %arg21 : i32 to index
      %c0_133 = arith.constant 0 : index
      %c0_134 = arith.constant 0 : index
      %143 = vector.load %arg16[%142, %c0_133, %c0_134] : memref<3x8x1xf32, #tpu.memory_space<vmem>>, vector<1x8x1xf32>
      %144 = vector.shape_cast %143 : vector<1x8x1xf32> to vector<8x1xf32>
      %145 = arith.index_cast %arg21 : i32 to index
      %c0_135 = arith.constant 0 : index
      %c0_136 = arith.constant 0 : index
      %146 = vector.load %arg17[%145, %c0_135, %c0_136] : memref<3x8x1xf32, #tpu.memory_space<vmem>>, vector<1x8x1xf32>
      %147 = vector.shape_cast %146 : vector<1x8x1xf32> to vector<8x1xf32>
      %148 = vector.broadcast %144 : vector<8x1xf32> to vector<8x384xf32>
      %149 = arith.mulf %141, %148 : vector<8x384xf32>
      %150 = vector.broadcast %147 : vector<8x1xf32> to vector<8x384xf32>
      %151 = arith.addf %149, %150 : vector<8x384xf32>
      %cst_137 = arith.constant 0.000000e+00 : f32
      %152 = vector.broadcast %cst_137 : f32 to vector<8x384xf32>
      %153 = arith.maximumf %151, %152 : vector<8x384xf32>
      %154 = vector.broadcast %0 : vector<1x384xf32> to vector<8x384xf32>
      %155 = arith.mulf %153, %154 : vector<8x384xf32>
      %156 = arith.index_cast %arg21 : i32 to index
      %c0_138 = arith.constant 0 : index
      %c0_139 = arith.constant 0 : index
      %157 = vector.load %arg18[%156, %c0_138, %c0_139] : memref<3x8x72xf32, #tpu.memory_space<vmem>>, vector<1x8x72xf32>
      %158 = vector.shape_cast %157 : vector<1x8x72xf32> to vector<8x72xf32>
      %c19_i32_140 = arith.constant 19 : i32
      %159 = tpu.dynamic_rotate %155 by %c19_i32_140 dim 1 : vector<8x384xf32>, i32 -> vector<8x384xf32>
      %c0_141 = arith.constant 0 : index
      %c0_142 = arith.constant 0 : index
      %160 = vector.load %arg20[%c0_141, %c0_142] : memref<144x384xf32, #tpu.memory_space<vmem>>, vector<8x384xf32>
      tpu.vector_store %arg20[%c0_141, %c0_142], %159 {strides = array<i32>} : memref<144x384xf32, #tpu.memory_space<vmem>>, vector<8x384xf32>,
      %c18_i32_143 = arith.constant 18 : i32
      %161 = tpu.dynamic_rotate %155 by %c18_i32_143 dim 1 : vector<8x384xf32>, i32 -> vector<8x384xf32>
      %c8_144 = arith.constant 8 : index
      %c0_145 = arith.constant 0 : index
      %162 = vector.load %arg20[%c8_144, %c0_145] : memref<144x384xf32, #tpu.memory_space<vmem>>, vector<8x384xf32>
      tpu.vector_store %arg20[%c8_144, %c0_145], %161 {strides = array<i32>} : memref<144x384xf32, #tpu.memory_space<vmem>>, vector<8x384xf32>,
      %c17_i32_146 = arith.constant 17 : i32
      %163 = tpu.dynamic_rotate %155 by %c17_i32_146 dim 1 : vector<8x384xf32>, i32 -> vector<8x384xf32>
      %c16_147 = arith.constant 16 : index
      %c0_148 = arith.constant 0 : index
      %164 = vector.load %arg20[%c16_147, %c0_148] : memref<144x384xf32, #tpu.memory_space<vmem>>, vector<8x384xf32>
      tpu.vector_store %arg20[%c16_147, %c0_148], %163 {strides = array<i32>} : memref<144x384xf32, #tpu.memory_space<vmem>>, vector<8x384xf32>,
      %c1_i32_149 = arith.constant 1 : i32
      %165 = tpu.dynamic_rotate %155 by %c1_i32_149 dim 1 : vector<8x384xf32>, i32 -> vector<8x384xf32>
      %c24_150 = arith.constant 24 : index
      %c0_151 = arith.constant 0 : index
      %166 = vector.load %arg20[%c24_150, %c0_151] : memref<144x384xf32, #tpu.memory_space<vmem>>, vector<8x384xf32>
      tpu.vector_store %arg20[%c24_150, %c0_151], %165 {strides = array<i32>} : memref<144x384xf32, #tpu.memory_space<vmem>>, vector<8x384xf32>,
      %c32_152 = arith.constant 32 : index
      %c0_153 = arith.constant 0 : index
      %167 = vector.load %arg20[%c32_152, %c0_153] : memref<144x384xf32, #tpu.memory_space<vmem>>, vector<8x384xf32>
      tpu.vector_store %arg20[%c32_152, %c0_153], %155 {strides = array<i32>} : memref<144x384xf32, #tpu.memory_space<vmem>>, vector<8x384xf32>,
      %c383_i32_154 = arith.constant 383 : i32
      %168 = tpu.dynamic_rotate %155 by %c383_i32_154 dim 1 : vector<8x384xf32>, i32 -> vector<8x384xf32>
      %c40_155 = arith.constant 40 : index
      %c0_156 = arith.constant 0 : index
      %169 = vector.load %arg20[%c40_155, %c0_156] : memref<144x384xf32, #tpu.memory_space<vmem>>, vector<8x384xf32>
      tpu.vector_store %arg20[%c40_155, %c0_156], %168 {strides = array<i32>} : memref<144x384xf32, #tpu.memory_space<vmem>>, vector<8x384xf32>,
      %c367_i32_157 = arith.constant 367 : i32
      %170 = tpu.dynamic_rotate %155 by %c367_i32_157 dim 1 : vector<8x384xf32>, i32 -> vector<8x384xf32>
      %c48_158 = arith.constant 48 : index
      %c0_159 = arith.constant 0 : index
      %171 = vector.load %arg20[%c48_158, %c0_159] : memref<144x384xf32, #tpu.memory_space<vmem>>, vector<8x384xf32>
      tpu.vector_store %arg20[%c48_158, %c0_159], %170 {strides = array<i32>} : memref<144x384xf32, #tpu.memory_space<vmem>>, vector<8x384xf32>,
      %c366_i32_160 = arith.constant 366 : i32
      %172 = tpu.dynamic_rotate %155 by %c366_i32_160 dim 1 : vector<8x384xf32>, i32 -> vector<8x384xf32>
      %c56_161 = arith.constant 56 : index
      %c0_162 = arith.constant 0 : index
      %173 = vector.load %arg20[%c56_161, %c0_162] : memref<144x384xf32, #tpu.memory_space<vmem>>, vector<8x384xf32>
      tpu.vector_store %arg20[%c56_161, %c0_162], %172 {strides = array<i32>} : memref<144x384xf32, #tpu.memory_space<vmem>>, vector<8x384xf32>,
      %c365_i32_163 = arith.constant 365 : i32
      %174 = tpu.dynamic_rotate %155 by %c365_i32_163 dim 1 : vector<8x384xf32>, i32 -> vector<8x384xf32>
      %c64_164 = arith.constant 64 : index
      %c0_165 = arith.constant 0 : index
      %175 = vector.load %arg20[%c64_164, %c0_165] : memref<144x384xf32, #tpu.memory_space<vmem>>, vector<8x384xf32>
      tpu.vector_store %arg20[%c64_164, %c0_165], %174 {strides = array<i32>} : memref<144x384xf32, #tpu.memory_space<vmem>>, vector<8x384xf32>,
      %c0_166 = arith.constant 0 : index
      %c0_167 = arith.constant 0 : index
      %176 = vector.load %arg20[%c0_166, %c0_167] : memref<144x384xf32, #tpu.memory_space<vmem>>, vector<72x384xf32>
      %cst_168 = arith.constant dense<0.000000e+00> : vector<8x384xf32>
      %177 = tpu.matmul %158, %176, %cst_168 {dimension_numbers = #tpu.dot_dimension_numbers<[1], [0], [0], [1], [0, 0, 1, 1], [], []>} : vector<8x72xf32>, vector<72x384xf32>, vector<8x384xf32> -> vector<8x384xf32>
      %178 = arith.addf %arg22, %177 : vector<8x384xf32>
      scf.yield %178 : vector<8x384xf32>
    }
    %c3_i32_93 = arith.constant 3 : i32
    %c0_94 = arith.constant 0 : index
    %c0_95 = arith.constant 0 : index
    %c0_96 = arith.constant 0 : index
    %103 = vector.load %arg19[%c0_94, %c0_95, %c0_96] : memref<1x8x384xf32, #tpu.memory_space<vmem>>, vector<1x8x384xf32>
    %104 = vector.shape_cast %103 : vector<1x8x384xf32> to vector<8x384xf32>
    %105 = vector.shape_cast %102 : vector<8x384xf32> to vector<1x8x384xf32>
    tpu.vector_store %arg19[%c0_94, %c0_95, %c0_96], %105 {strides = array<i32>} : memref<1x8x384xf32, #tpu.memory_space<vmem>>, vector<1x8x384xf32>,
    return
  }
  func.func @transform_0(%arg0: i32) -> (i32, i32, i32) {
    %c0_i32 = arith.constant 0 : i32
    %c0_i32_0 = arith.constant 0 : i32
    %c0_i32_1 = arith.constant 0 : i32
    return %arg0, %c0_i32, %c0_i32_0 : i32, i32, i32
  }
  func.func @transform_1(%arg0: i32) -> (i32, i32, i32) {
    %c0_i32 = arith.constant 0 : i32
    %c0_i32_0 = arith.constant 0 : i32
    %c0_i32_1 = arith.constant 0 : i32
    return %arg0, %c0_i32, %c0_i32_0 : i32, i32, i32
  }
  func.func @transform_2(%arg0: i32) -> (i32, i32) {
    %c0_i32 = arith.constant 0 : i32
    %c0_i32_0 = arith.constant 0 : i32
    %c0_i32_1 = arith.constant 0 : i32
    return %c0_i32, %c0_i32_0 : i32, i32
  }
  func.func @transform_3(%arg0: i32) -> (i32, i32) {
    %c0_i32 = arith.constant 0 : i32
    %c0_i32_0 = arith.constant 0 : i32
    %c0_i32_1 = arith.constant 0 : i32
    return %c0_i32, %c0_i32_0 : i32, i32
  }
  func.func @transform_4(%arg0: i32) -> (i32, i32) {
    %c0_i32 = arith.constant 0 : i32
    %c0_i32_0 = arith.constant 0 : i32
    %c0_i32_1 = arith.constant 0 : i32
    return %c0_i32, %c0_i32_0 : i32, i32
  }
  func.func @transform_5(%arg0: i32) -> (i32, i32) {
    %c0_i32 = arith.constant 0 : i32
    %c0_i32_0 = arith.constant 0 : i32
    %c0_i32_1 = arith.constant 0 : i32
    return %c0_i32, %c0_i32_0 : i32, i32
  }
  func.func @transform_6(%arg0: i32) -> (i32, i32) {
    %c0_i32 = arith.constant 0 : i32
    %c0_i32_0 = arith.constant 0 : i32
    %c0_i32_1 = arith.constant 0 : i32
    return %c0_i32, %c0_i32_0 : i32, i32
  }
  func.func @transform_7(%arg0: i32) -> (i32, i32) {
    %c0_i32 = arith.constant 0 : i32
    %c0_i32_0 = arith.constant 0 : i32
    %c0_i32_1 = arith.constant 0 : i32
    return %c0_i32, %c0_i32_0 : i32, i32
  }
  func.func @transform_8(%arg0: i32) -> (i32, i32) {
    %c0_i32 = arith.constant 0 : i32
    %c0_i32_0 = arith.constant 0 : i32
    %c0_i32_1 = arith.constant 0 : i32
    return %c0_i32, %c0_i32_0 : i32, i32
  }
  func.func @transform_9(%arg0: i32) -> (i32, i32) {
    %c0_i32 = arith.constant 0 : i32
    %c0_i32_0 = arith.constant 0 : i32
    %c0_i32_1 = arith.constant 0 : i32
    return %c0_i32, %c0_i32_0 : i32, i32
  }
  func.func @transform_10(%arg0: i32) -> (i32, i32) {
    %c0_i32 = arith.constant 0 : i32
    %c0_i32_0 = arith.constant 0 : i32
    %c0_i32_1 = arith.constant 0 : i32
    return %c0_i32, %c0_i32_0 : i32, i32
  }
  func.func @transform_11(%arg0: i32) -> (i32, i32) {
    %c0_i32 = arith.constant 0 : i32
    %c0_i32_0 = arith.constant 0 : i32
    %c0_i32_1 = arith.constant 0 : i32
    return %c0_i32, %c0_i32_0 : i32, i32
  }
  func.func @transform_12(%arg0: i32) -> (i32, i32, i32) {
    %c0_i32 = arith.constant 0 : i32
    %c0_i32_0 = arith.constant 0 : i32
    %c0_i32_1 = arith.constant 0 : i32
    %c0_i32_2 = arith.constant 0 : i32
    return %c0_i32, %c0_i32_0, %c0_i32_1 : i32, i32, i32
  }
  func.func @transform_13(%arg0: i32) -> (i32, i32, i32) {
    %c0_i32 = arith.constant 0 : i32
    %c0_i32_0 = arith.constant 0 : i32
    %c0_i32_1 = arith.constant 0 : i32
    %c0_i32_2 = arith.constant 0 : i32
    return %c0_i32, %c0_i32_0, %c0_i32_1 : i32, i32, i32
  }
  func.func @transform_14(%arg0: i32) -> (i32, i32, i32) {
    %c0_i32 = arith.constant 0 : i32
    %c0_i32_0 = arith.constant 0 : i32
    %c0_i32_1 = arith.constant 0 : i32
    %c0_i32_2 = arith.constant 0 : i32
    return %c0_i32, %c0_i32_0, %c0_i32_1 : i32, i32, i32
  }
  func.func @transform_15(%arg0: i32) -> (i32, i32, i32) {
    %c0_i32 = arith.constant 0 : i32
    %c0_i32_0 = arith.constant 0 : i32
    %c0_i32_1 = arith.constant 0 : i32
    %c0_i32_2 = arith.constant 0 : i32
    return %c0_i32, %c0_i32_0, %c0_i32_1 : i32, i32, i32
  }
  func.func @transform_16(%arg0: i32) -> (i32, i32, i32) {
    %c0_i32 = arith.constant 0 : i32
    %c0_i32_0 = arith.constant 0 : i32
    %c0_i32_1 = arith.constant 0 : i32
    %c0_i32_2 = arith.constant 0 : i32
    return %c0_i32, %c0_i32_0, %c0_i32_1 : i32, i32, i32
  }
  func.func @transform_17(%arg0: i32) -> (i32, i32, i32) {
    %c0_i32 = arith.constant 0 : i32
    %c0_i32_0 = arith.constant 0 : i32
    %c0_i32_1 = arith.constant 0 : i32
    %c0_i32_2 = arith.constant 0 : i32
    return %c0_i32, %c0_i32_0, %c0_i32_1 : i32, i32, i32
  }
  func.func @transform_18(%arg0: i32) -> (i32, i32, i32) {
    %c0_i32 = arith.constant 0 : i32
    %c0_i32_0 = arith.constant 0 : i32
    %c0_i32_1 = arith.constant 0 : i32
    return %arg0, %c0_i32, %c0_i32_0 : i32, i32, i32
  }
}

</mosaic_0001>

<bundles_post_ra>
// kernel: decoder_block_res4b.2
= control target key start
LH: loop header
LB: loop body
LE: loop exit
PB: predicated region body
PF: predicated region fallthrough
CT: control target
= control target key end

     0   :  { %s476_s15 = smov 0   ;;  %s521_s0 = inlined_call_operand.vmem [shape: f32[2,16,64], index: 0, kind: input, shape index: {}]   ;;  %s522_s1 = inlined_call_operand.vmem [shape: f32[16,1], index: 1, kind: input, shape index: {}]   ;;  %s523_s2 = inlined_call_operand.vmem [shape: f32[16,1], index: 2, kind: input, shape index: {}]   ;;  %s524_s3 = inlined_call_operand.vmem [shape: f32[32,16], index: 3, kind: input, shape index: {}]   ;;  %s525_s4 = inlined_call_operand.vmem [shape: f32[2,32,64], index: 4, kind: output, shape index: {}]  }
   0x1 LB: > { %s394_s16 = sadd.s32 4294967295, %s448_s15   ;;  %p398_p0 = scmp.ge.s32.totalorder %s448_s15, 1  ;;  %s448_s15 = sphi %s476_s15, %s14_s15  }
   0x2   : > { %p162_p1 = scmp.lt.s32.totalorder %s448_s15, 3 }
   0x4   : > { %p163_p2 = pnand %p398_p0, %p162_p1 }
   0x5   : > { %p188_p3 = scmp.lt.s32.totalorder (!%p163_p2), %s394_s16, 1 }
   0x6   : > { %166 = sbr.rel (%p163_p2) target bundleno = 345 (0x159), region = 36 }
   0xb   : > { %v215_v0 = vld [vmem:[%s523_s2 + $0x8] sm:$0xff]  ;;  %v450_v2 = vmov 0   ;;  %v214_v3 = vld [vmem:[%s523_s2] sm:$0xff]  ;;  %vm232_vm0 = vcmask 130048   ;;  %v230_v6 = vld [vmem:[%s524_s3 + $0x10] sm:$0xff]  ;;  %s527_s16 = smov (!%p188_p3, %s394_s16), 1 }
   0xc   : > { %v201_v1 = vld [vmem:[%s522_s1 + $0x8] sm:$0xff]  ;;  %441 = vset.pattern.permute.xlu1 %v450_v2  ;;  %440 = vset.pattern.permute.xlu0 %v450_v2  ;;  %v200_v4 = vld [vmem:[%s522_s1] sm:$0xff]  ;;  %s409_s29 = sshll.u32 %s527_s16, 4  ;;  %v231_v18 = vld [vmem:[%s524_s3 + $0x18] sm:$0xff]  ;;  %s410_s11 = sshll.u32 %s527_s16, 5  ;;  %vm334_vm1 = vcmask 523264  }
   0xd   : > { %223 = vperm.xlu1 %441, %v215_v0   ;;  %209 = vperm.xlu0 %440, %v201_v1   ;;  %v228_v5 = vld [vmem:[%s524_s3] sm:$0xff]  ;;  %s192_s6 = scalar_lea.vmem %s521_s0, %s409_s29  ;;  %v229_v17 = vld [vmem:[%s524_s3 + $0x8] sm:$0xff]  ;;  %s197_s14 = scalar_lea.vmem %s525_s4, %s410_s11 }
   0xe   : > { %421 = vmatprep.mubr.msk.f32.mxu0 %vm232_vm0, %v228_v5  ;;  %424 = vmatprep.mubr.msk.f32.mxu1 %vm232_vm0, %v230_v6  ;;  %v199_v7 = vld [vmem:[%s192_s6 + $0x8] sm:$0xff]  ;;  %v198_v11 = vld [vmem:[%s192_s6] sm:$0xff] }
  0x11   : > { %218 = vperm.xlu1 %441, %v214_v3   ;;  %204 = vperm.xlu0 %440, %v200_v4  }
  0x88   : > { %v224_v8 = vpop.permute.xlu1 %223  ;;  %v210_v9 = vpop.permute.xlu0 %209 }
  0x89   : > { %v213_v10 = vmul.f32 %v210_v9, %v199_v7 }
  0x8b   : > { %v227_v12 = vadd.f32 %v224_v8, %v213_v10 }
  0x8c   : > { %v205_v13 = vpop.permute.xlu0 %204  ;;  %v219_v15 = vpop.permute.xlu1 %218 }
  0x8d   : > { %v212_v14 = vmul.f32 %v205_v13, %v198_v11  ;;  %417 = vmatprep.subr.mxu0 %v227_v12  ;;  %427 = vmatprep.subr.mxu1 %v227_v12 }
  0x8e   : > { %418 = vmatpush3.msra.mxu0 %v227_v12  ;;  %429 = vmatpush3.msra.mxu1 %v227_v12 }
  0x8f   : > { %v226_v16 = vadd.f32 %v219_v15, %v212_v14 }
  0x91   : > { %419 = vmatprep.subr.mxu0 %v226_v16  ;;  %428 = vmatprep.subr.mxu1 %v226_v16 }
  0x92   : > { %420 = vmatpush3.msra.mxu0 %v226_v16  ;;  %430 = vmatpush3.msra.mxu1 %v226_v16 }
  0x93   : > { %422 = vmatmul.mubr.msk.f32.vlgmr.msra.gmra.mxu0 %vm232_vm0, %v229_v17  ;;  %425 = vmatmul.mubr.msk.f32.vlgmr.msra.gmra.mxu1 %vm232_vm0, %v231_v18 }
 0x153   : > { %v423_v19 = vpop.f32.mrf.mxu0  ;;  %v426_v20 = vpop.f32.mrf.mxu1 }
 0x154   : > { %v331_v21 = vmax.f32 %v423_v19, 0.0  ;;  %v333_v22 = vmax.f32 %v426_v20, 0.0 }
 0x155   : > { %v311_v23 = vpop.f32.mrf.mxu0  ;;  %v321_v24 = vpop.f32.mrf.mxu1 }
 0x156   : > { %336 = vst.msk [vmem:[%s197_s14 + $0x8] sm:$0xff] %vm334_vm1, %v331_v21  ;;  %338 = vst.msk [vmem:[%s197_s14 + $0x18] sm:$0xff] %vm334_vm1, %v333_v22  ;;  %v330_v25 = vmax.f32 %v311_v23, 0.0  ;;  %v332_v26 = vmax.f32 %v321_v24, 0.0 }
 0x158   : > { %335 = vst.msk [vmem:[%s197_s14] sm:$0xff] %vm334_vm1, %v330_v25  ;;  %337 = vst.msk [vmem:[%s197_s14 + $0x10] sm:$0xff] %vm334_vm1, %v332_v26 }
 0x159 PF: > { %s14_s15 = sadd.s32 1, %s448_s15  }
 0x15a   : > { %p11_p4 = scmp.ge.s32.totalorder %s14_s15, 4  }
 0x15c   :  { %13 = sbr.rel (!%p11_p4) target bundleno = 1 (0x1), region = 66 }

// kernel: decoder_block_res4b.3
= control target key start
LH: loop header
LB: loop body
LE: loop exit
PB: predicated region body
PF: predicated region fallthrough
CT: control target
= control target key end

     0   :  { %s2734_s27 = smov 0   ;;  %s3497_s0 = inlined_call_operand.vmem [shape: f32[2,8,384], index: 0, kind: input, shape index: {}]   ;;  %s3498_s1 = inlined_call_operand.vmem [shape: f32[2,8,384], index: 1, kind: input, shape index: {}]   ;;  %s3499_s2 = inlined_call_operand.vmem [shape: f32[1,384], index: 2, kind: input, shape index: {}]   ;;  %s3500_s3 = inlined_call_operand.vmem [shape: f32[16,1], index: 3, kind: input, shape index: {}]   ;;  %s3501_s4 = inlined_call_operand.vmem [shape: f32[16,1], index: 4, kind: input, shape index: {}]   ;;  %s3502_s5 = inlined_call_operand.vmem [shape: f32[8,144], index: 5, kind: input, shape index: {}]   ;;  %s3503_s6 = inlined_call_operand.vmem [shape: f32[8,1], index: 6, kind: input, shape index: {}]   ;;  %s3504_s7 = inlined_call_operand.vmem [shape: f32[8,1], index: 7, kind: input, shape index: {}]   ;;  %s3505_s8 = inlined_call_operand.vmem [shape: f32[8,72], index: 8, kind: input, shape index: {}]   ;;  %s3506_s9 = inlined_call_operand.vmem [shape: f32[8,8], index: 9, kind: input, shape index: {}]   ;;  %s3507_s10 = inlined_call_operand.vmem [shape: f32[8,8], index: 10, kind: input, shape index: {}]   ;;  %s3508_s11 = inlined_call_operand.vmem [shape: f32[8,1], index: 11, kind: input, shape index: {}]   ;;  %s3509_s12 = inlined_call_operand.vmem [shape: f32[3,8,1], index: 12, kind: input, shape index: {}]   ;;  %s3510_s13 = inlined_call_operand.vmem [shape: f32[3,8,1], index: 13, kind: input, shape index: {}]   ;;  %s3511_s14 = inlined_call_operand.vmem [shape: f32[3,8,72], index: 14, kind: input, shape index: {}]   ;;  %s3512_s15 = inlined_call_operand.vmem [shape: f32[3,8,1], index: 15, kind: input, shape index: {}]   ;;  %s3513_s16 = inlined_call_operand.vmem [shape: f32[3,8,1], index: 16, kind: input, shape index: {}]   ;;  %s3514_s17 = inlined_call_operand.vmem [shape: f32[3,8,72], index: 17, kind: input, shape index: {}]   ;;  %s3515_s18 = inlined_call_operand.vmem [shape: f32[2,8,384], index: 18, kind: output, shape index: {}]  }
   0x1   :  { %3522 = sst [smem:[#allocation3_spill]] %s3497_s0 }
   0x2   :  { %3523 = sst [smem:[#allocation4_spill]] %s3498_s1 }
   0x3   :  { %3524 = sst [smem:[#allocation5_spill]] %s3499_s2 }
   0x4 LB: > { %s2380_s28 = sadd.s32 4294967295, %s2599_s27   ;;  %p2384_p0 = scmp.ge.s32.totalorder %s2599_s27, 1  ;;  %s2599_s27 = sphi %s2734_s27, %s28_s27  }
   0x5   : > { %p522_p1 = scmp.lt.s32.totalorder %s2599_s27, 3 }
   0x7   : > { %p523_p2 = pnand %p2384_p0, %p522_p1 }
   0x8   : > { %p581_p3 = scmp.lt.s32.totalorder (!%p523_p2), %s2380_s28, 1  ;;  %s3525_s30 = sld [smem:[#allocation4_spill]] (!%p523_p2) }
   0x9   : > { %526 = sbr.rel (%p523_p2) target bundleno = 1793 (0x701), region = 92  ;;  %s3526_s1 = sld [smem:[#allocation5_spill]] (!%p523_p2) }
   0xa   : > { %s2619_s20 = smov (!%p523_p2), 111   ;;  %s2620_s21 = smov (!%p523_p2), 127  }
   0xb   : > { %s2621_s22 = smov (!%p523_p2), 1   ;;  %s2622_s23 = smov (!%p523_p2), 17  }
   0xc   : > { %s3527_s29 = sld [smem:[#allocation3_spill]] (!%p523_p2)  ;;  %s2626_s19 = smov (!%p523_p2), 110  }
   0xe   : > { %v643_v0 = vld [vmem:[%s3500_s3 + $0x8] sm:$0xff]  ;;  %v603_v1 = vld [vmem:[%s3500_s3] sm:$0xff]  ;;  %v2617_v2 = vmov 0   ;;  %s3535_s28 = smov (!%p581_p3, %s2380_s28), 1  ;;  %v625_v5 = vlaneseq  ;;  %v2618_v18 = vmov 0.0   ;;  %vm931_vm0 = vcmask 130048  }
   0xf   : > { %2573 = vset.pattern.permute.xlu0 %v2617_v2  ;;  %2574 = vset.pattern.permute.xlu1 %v2617_v2  ;;  %v644_v3 = vld [vmem:[%s3501_s4 + $0x8] sm:$0xff]  ;;  %v604_v4 = vld [vmem:[%s3501_s4] sm:$0xff]  ;;  %s2754_s2 = smul.u32 24, %s3535_s28  ;;  %s2625_s28 = smov 109   ;;  %vm2627_vm9 = vmmov 0   ;;  %vm1227_vm10 = vcmask 588800  }
  0x10   : > { %647 = vperm.xlu0 %2573, %v643_v0   ;;  %607 = vperm.xlu1 %2574, %v603_v1   ;;  %v626_v6 = vshrl.u32 %v625_v5, 7  ;;  %v596_v14 = vld [vmem:[%s3526_s1] sm:$0x7]  ;;  %v876_v49 = vld [vmem:[%s3502_s5 + $0x8] sm:$0xff]  ;;  %v2923_v52 = vand.u32 127, %v625_v5  ;;  %vm1374_vm11 = vcmask 64512  }
  0x11   : > { %s2760_s25 = scalar_lea.vmem %s3515_s18, %s2754_s2  ;;  %s590_s0 = scalar_lea.vmem %s3525_s30, %s2754_s2  ;;  %1006 = vmatprep.subr.mxu1 %v2618_v18  ;;  %2389 = vmatprep.mubr.msk.f32.mxu1 %vm931_vm0, %v876_v49  ;;  %v1077_v50 = vld [vmem:[%s3504_s7] sm:$0xff] }
  0x12   : > { %v2767_v8 = vld [vmem:[%s590_s0] sm:$0xff]  ;;  %v2769_v9 = vld [vmem:[%s590_s0 + $0x8] sm:$0xff]  ;;  %v2771_v10 = vld [vmem:[%s590_s0 + $0x10] sm:$0xff]  ;;  %v627_v11 = vsub.s32 0, %v626_v6  ;;  %v631_v12 = vsub.s32 1, %v626_v6  ;;  %v635_v13 = vsub.s32 2, %v626_v6  ;;  %s585_s30 = scalar_lea.vmem %s3527_s29, %s2754_s2  ;;  %2388 = vmatprep.mubr.msk.f32.mxu0 %vm931_vm0, %v876_v49 }
  0x13   : > { %v2819_v33 = vld [vmem:[%s585_s30 + $0x8] sm:$0xff]  ;;  %v2821_v34 = vld [vmem:[%s585_s30 + $0x10] sm:$0xff]  ;;  %v2829_v37 = vld [vmem:[%s585_s30] sm:$0xff]  ;;  %s2623_s0 = smov 18   ;;  %s2624_s2 = smov 19   ;;  %vm743_vm1 = vcmp.lt.s32.totalorder %v2923_v52, 111 }
  0x14   : > { %655 = vperm.xlu0 %2573, %v644_v3   ;;  %615 = vperm.xlu1 %2574, %v604_v4   ;;  %v2780_v20 = vrot.slane %v596_v14, %v627_v11  ;;  %v2782_v21 = vrot.slane %v596_v14, %v631_v12  ;;  %v2784_v22 = vrot.slane %v596_v14, %v635_v13  ;;  %v1076_v51 = vld [vmem:[%s3503_s6] sm:$0xff]  ;;  %vm730_vm2 = vcmp.lt.s32.totalorder %v2923_v52, 127  ;;  %s3202_s29 = smov 0  }
  0x15   : > { %vm714_vm3 = vcmp.lt.s32.totalorder %v2923_v52, 1  ;;  %vm701_vm4 = vcmp.lt.s32.totalorder %v2923_v52, 17  ;;  %vm688_vm5 = vcmp.lt.s32.totalorder %v2923_v52, 18  ;;  %vm675_vm6 = vcmp.lt.s32.totalorder %v2923_v52, 19 }
  0x16   : > { %vm769_vm7 = vcmp.lt.s32.totalorder %v2923_v52, 109  ;;  %vm756_vm8 = vcmp.lt.s32.totalorder %v2923_v52, 110 }
  0x8b   : > { %v648_v7 = vpop.permute.xlu0 %647  ;;  %v608_v32 = vpop.permute.xlu1 %607 }
  0x8c   : > { %v650_v15 = vmul.f32 %v648_v7, %v2767_v8  ;;  %v651_v16 = vmul.f32 %v648_v7, %v2769_v9  ;;  %v652_v17 = vmul.f32 %v648_v7, %v2771_v10  ;;  %v611_v35 = vmul.f32 %v608_v32, %v2819_v33 }
  0x8d   : > { %v612_v36 = vmul.f32 %v608_v32, %v2821_v34  ;;  %v610_v39 = vmul.f32 %v608_v32, %v2829_v37 }
  0x8f   : > { %v656_v19 = vpop.permute.xlu0 %655  ;;  %v616_v38 = vpop.permute.xlu1 %615 }
  0x90   : > { %v658_v23 = vadd.f32 %v656_v19, %v650_v15  ;;  %v659_v24 = vadd.f32 %v656_v19, %v651_v16  ;;  %v660_v25 = vadd.f32 %v656_v19, %v652_v17  ;;  %v619_v40 = vadd.f32 %v616_v38, %v611_v35 }
  0x91   : > { %v620_v41 = vadd.f32 %v616_v38, %v612_v36  ;;  %v618_v42 = vadd.f32 %v616_v38, %v610_v39 }
  0x92   : > { %v661_v26 = vmax.f32 %v658_v23, 0.0  ;;  %v662_v27 = vmax.f32 %v659_v24, 0.0  ;;  %v663_v28 = vmax.f32 %v660_v25, 0.0  ;;  %v622_v43 = vmax.f32 %v619_v40, 0.0 }
  0x93   : > { %v623_v44 = vmax.f32 %v620_v41, 0.0  ;;  %v621_v45 = vmax.f32 %v618_v42, 0.0 }
  0x94   : > { %v2787_v29 = vmul.f32 %v661_v26, %v2780_v20  ;;  %v2790_v30 = vmul.f32 %v662_v27, %v2782_v21  ;;  %v2793_v31 = vmul.f32 %v663_v28, %v2784_v22  ;;  %v2845_v46 = vmul.f32 %v2782_v21, %v622_v43 }
  0x95   : > { %v2848_v47 = vmul.f32 %v2784_v22, %v623_v44  ;;  %v2855_v48 = vmul.f32 %v2780_v20, %v621_v45 }
  0x96   : > { %843 = vrot.lane.b32.xlu1 %v2793_v31, %s2619_s20  ;;  %841 = vrot.lane.b32.xlu0 %v2790_v30, %s2619_s20 }
  0x9a   : > { %829 = vrot.lane.b32.xlu1 %v2790_v30, %s2620_s21  ;;  %839 = vrot.lane.b32.xlu0 %v2787_v29, %s2619_s20 }
  0x9e   : > { %827 = vrot.lane.b32.xlu1 %v2787_v29, %s2620_s21  ;;  %831 = vrot.lane.b32.xlu0 %v2793_v31, %s2620_s21 }
  0xa2   : > { %814 = vrot.lane.b32.xlu1 %v2790_v30, %s2621_s22  ;;  %812 = vrot.lane.b32.xlu0 %v2787_v29, %s2621_s22 }
  0xa6   : > { %800 = vrot.lane.b32.xlu1 %v2787_v29, %s2622_s23  ;;  %816 = vrot.lane.b32.xlu0 %v2793_v31, %s2621_s22 }
  0xaa   : > { %804 = vrot.lane.b32.xlu1 %v2793_v31, %s2622_s23  ;;  %802 = vrot.lane.b32.xlu0 %v2790_v30, %s2622_s23 }
  0xae   : > { %790 = vrot.lane.b32.xlu1 %v2790_v30, %s2623_s0  ;;  %788 = vrot.lane.b32.xlu0 %v2787_v29, %s2623_s0 }
  0xb2   : > { %776 = vrot.lane.b32.xlu1 %v2787_v29, %s2624_s2  ;;  %792 = vrot.lane.b32.xlu0 %v2793_v31, %s2623_s0 }
  0xb6   : > { %780 = vrot.lane.b32.xlu1 %v2793_v31, %s2624_s2  ;;  %778 = vrot.lane.b32.xlu0 %v2790_v30, %s2624_s2 }
  0xba   : > { %767 = vrot.lane.b32.xlu1 %v2848_v47, %s2625_s28  ;;  %765 = vrot.lane.b32.xlu0 %v2845_v46, %s2625_s28 }
  0xbe   : > { %752 = vrot.lane.b32.xlu1 %v2845_v46, %s2626_s19  ;;  %763 = vrot.lane.b32.xlu0 %v2855_v48, %s2625_s28 }
  0xc2   : > { %750 = vrot.lane.b32.xlu1 %v2855_v48, %s2626_s19  ;;  %754 = vrot.lane.b32.xlu0 %v2848_v47, %s2626_s19 }
  0xc6   : > { %741 = vrot.lane.b32.xlu1 %v2848_v47, %s2619_s20  ;;  %739 = vrot.lane.b32.xlu0 %v2845_v46, %s2619_s20 }
  0xca   : > { %726 = vrot.lane.b32.xlu1 %v2845_v46, %s2620_s21  ;;  %737 = vrot.lane.b32.xlu0 %v2855_v48, %s2619_s20 }
  0xce   : > { %724 = vrot.lane.b32.xlu1 %v2855_v48, %s2620_s21  ;;  %728 = vrot.lane.b32.xlu0 %v2848_v47, %s2620_s21 }
  0xd2   : > { %710 = vrot.lane.b32.xlu1 %v2845_v46, %s2621_s22  ;;  %708 = vrot.lane.b32.xlu0 %v2855_v48, %s2621_s22 }
  0xd6   : > { %695 = vrot.lane.b32.xlu1 %v2855_v48, %s2622_s23  ;;  %712 = vrot.lane.b32.xlu0 %v2848_v47, %s2621_s22 }
  0xda   : > { %699 = vrot.lane.b32.xlu1 %v2848_v47, %s2622_s23  ;;  %697 = vrot.lane.b32.xlu0 %v2845_v46, %s2622_s23 }
  0xde   : > { %684 = vrot.lane.b32.xlu1 %v2845_v46, %s2623_s0  ;;  %682 = vrot.lane.b32.xlu0 %v2855_v48, %s2623_s0 }
  0xe2   : > { %667 = vrot.lane.b32.xlu1 %v2855_v48, %s2624_s2  ;;  %686 = vrot.lane.b32.xlu0 %v2848_v47, %s2623_s0 }
  0xe6   : > { %671 = vrot.lane.b32.xlu1 %v2848_v47, %s2624_s2  ;;  %669 = vrot.lane.b32.xlu0 %v2845_v46, %s2624_s2 }
  0xea   : > { %867 = vrot.lane.b32.xlu1 %v2793_v31, %s2625_s28  ;;  %865 = vrot.lane.b32.xlu0 %v2790_v30, %s2625_s28 }
  0xee   : > { %853 = vrot.lane.b32.xlu1 %v2790_v30, %s2626_s19  ;;  %863 = vrot.lane.b32.xlu0 %v2787_v29, %s2625_s28 }
  0xf2   : > { %851 = vrot.lane.b32.xlu1 %v2787_v29, %s2626_s19  ;;  %855 = vrot.lane.b32.xlu0 %v2793_v31, %s2626_s19 }
  0xf6   : > { %1088 = vperm.xlu1 %2574, %v1077_v50   ;;  %1080 = vperm.xlu0 %2573, %v1076_v51  }
 0x108   : > { %v844_v53 = vpop.permute.xlu1 %843  ;;  %v842_v54 = vpop.permute.xlu0 %841 }
 0x109   : > { %v845_v55 = vsel %vm743_vm1, %v842_v54, %v844_v53 }
 0x10a   : > { %935 = vmatprep.subr.mxu0 %v845_v55 }
 0x10c   : > { %v830_v56 = vpop.permute.xlu1 %829  ;;  %v840_v57 = vpop.permute.xlu0 %839 }
 0x10d   : > { %v846_v58 = vsel %vm743_vm1, %v840_v57, %v842_v54  ;;  %v847_v59 = vsel %vm743_vm1, %v844_v53, %v840_v57 }
 0x10e   : > { %936 = vmatpush1.msra.mxu0 %v846_v58  ;;  %1007 = vmatpush1.msra.mxu1 %v847_v59 }
 0x10f   : > { %1008 = vmatprep.subr.mxu1 %v2618_v18 }
 0x110   : > { %v828_v60 = vpop.permute.xlu1 %827  ;;  %v832_v61 = vpop.permute.xlu0 %831 }
 0x111   : > { %v834_v62 = vsel %vm730_vm2, %v828_v60, %v830_v56  ;;  %v833_v63 = vsel %vm730_vm2, %v830_v56, %v832_v61  ;;  %v835_v0 = vsel %vm730_vm2, %v832_v61, %v828_v60 }
 0x112   : > { %937 = vmatprep.subr.mxu0 %v833_v63  ;;  %1009 = vmatpush1.msra.mxu1 %v835_v0 }
 0x113   : > { %938 = vmatpush1.msra.mxu0 %v834_v62  ;;  %1010 = vmatprep.subr.mxu1 %v2618_v18 }
 0x114   : > { %v815_v1 = vpop.permute.xlu1 %814  ;;  %v813_v2 = vpop.permute.xlu0 %812  ;;  %939 = vmatprep.subr.mxu0 %v2790_v30  ;;  %1011 = vmatpush1.msra.mxu1 %v2793_v31 }
 0x115   : > { %v819_v3 = vsel %vm714_vm3, %v813_v2, %v815_v1  ;;  %940 = vmatpush1.msra.mxu0 %v2787_v29  ;;  %1012 = vmatprep.subr.mxu1 %v2618_v18 }
 0x116   : > { %941 = vmatprep.subr.mxu0 %v819_v3 }
 0x118   : > { %v801_v4 = vpop.permute.xlu1 %800  ;;  %v817_v5 = vpop.permute.xlu0 %816 }
 0x119   : > { %v818_v6 = vsel %vm714_vm3, %v815_v1, %v817_v5  ;;  %v820_v7 = vsel %vm714_vm3, %v817_v5, %v813_v2 }
 0x11a   : > { %942 = vmatpush1.msra.mxu0 %v820_v7  ;;  %1013 = vmatpush1.msra.mxu1 %v818_v6 }
 0x11b   : > { %1014 = vmatprep.subr.mxu1 %v2618_v18 }
 0x11c   : > { %v805_v11 = vpop.permute.xlu1 %804  ;;  %v803_v12 = vpop.permute.xlu0 %802 }
 0x11d   : > { %v808_v13 = vsel %vm701_vm4, %v805_v11, %v801_v4  ;;  %v806_v14 = vsel %vm701_vm4, %v803_v12, %v805_v11  ;;  %v807_v15 = vsel %vm701_vm4, %v801_v4, %v803_v12 }
 0x11e   : > { %943 = vmatprep.subr.mxu0 %v807_v15  ;;  %1015 = vmatpush1.msra.mxu1 %v806_v14 }
 0x11f   : > { %944 = vmatpush1.msra.mxu0 %v808_v13  ;;  %1016 = vmatprep.subr.mxu1 %v2618_v18 }
 0x120   : > { %v791_v16 = vpop.permute.xlu1 %790  ;;  %v789_v17 = vpop.permute.xlu0 %788 }
 0x121   : > { %v795_v19 = vsel %vm688_vm5, %v789_v17, %v791_v16 }
 0x122   : > { %945 = vmatprep.subr.mxu0 %v795_v19 }
 0x124   : > { %v777_v23 = vpop.permute.xlu1 %776  ;;  %v793_v24 = vpop.permute.xlu0 %792 }
 0x125   : > { %v794_v25 = vsel %vm688_vm5, %v791_v16, %v793_v24  ;;  %v796_v26 = vsel %vm688_vm5, %v793_v24, %v789_v17 }
 0x126   : > { %946 = vmatpush1.msra.mxu0 %v796_v26  ;;  %1017 = vmatpush1.msra.mxu1 %v794_v25 }
 0x127   : > { %1018 = vmatprep.subr.mxu1 %v2618_v18 }
 0x128   : > { %v781_v27 = vpop.permute.xlu1 %780  ;;  %v779_v28 = vpop.permute.xlu0 %778 }
 0x129   : > { %v784_v29 = vsel %vm675_vm6, %v781_v27, %v777_v23  ;;  %v782_v30 = vsel %vm675_vm6, %v779_v28, %v781_v27  ;;  %v783_v31 = vsel %vm675_vm6, %v777_v23, %v779_v28 }
 0x12a   : > { %947 = vmatprep.subr.mxu0 %v783_v31  ;;  %1019 = vmatpush1.msra.mxu1 %v782_v30 }
 0x12b   : > { %948 = vmatpush1.msra.mxu0 %v784_v29  ;;  %1020 = vmatprep.subr.mxu1 %v2618_v18 }
 0x12c   : > { %v768_v32 = vpop.permute.xlu1 %767  ;;  %v766_v35 = vpop.permute.xlu0 %765 }
 0x12d   : > { %v770_v36 = vsel %vm769_vm7, %v766_v35, %v768_v32 }
 0x12e   : > { %949 = vmatprep.subr.mxu0 %v770_v36 }
 0x130   : > { %v753_v38 = vpop.permute.xlu1 %752  ;;  %v764_v39 = vpop.permute.xlu0 %763 }
 0x131   : > { %v771_v40 = vsel %vm769_vm7, %v764_v39, %v766_v35  ;;  %v772_v41 = vsel %vm769_vm7, %v768_v32, %v764_v39  ;;  %v875_v39 = vld [vmem:[%s3502_s5] sm:$0xff] }
 0x132   : > { %950 = vmatpush1.msra.mxu0 %v771_v40  ;;  %1021 = vmatpush1.msra.mxu1 %v772_v41 }
 0x133   : > { %1022 = vmatprep.subr.mxu1 %v2618_v18 }
 0x134   : > { %v751_v42 = vpop.permute.xlu1 %750  ;;  %v755_v43 = vpop.permute.xlu0 %754 }
 0x135   : > { %v758_v44 = vsel %vm756_vm8, %v751_v42, %v753_v38  ;;  %v757_v45 = vsel %vm756_vm8, %v753_v38, %v755_v43  ;;  %v759_v49 = vsel %vm756_vm8, %v755_v43, %v751_v42 }
 0x136   : > { %951 = vmatprep.subr.mxu0 %v757_v45  ;;  %1023 = vmatpush1.msra.mxu1 %v759_v49 }
 0x137   : > { %952 = vmatpush1.msra.mxu0 %v758_v44  ;;  %1024 = vmatprep.subr.mxu1 %v2618_v18 }
 0x138   : > { %v742_v50 = vpop.permute.xlu1 %741  ;;  %v740_v51 = vpop.permute.xlu0 %739 }
 0x139   : > { %v744_v53 = vsel %vm743_vm1, %v740_v51, %v742_v50 }
 0x13a   : > { %953 = vmatprep.subr.mxu0 %v744_v53 }
 0x13c   : > { %v727_v54 = vpop.permute.xlu1 %726  ;;  %v738_v55 = vpop.permute.xlu0 %737 }
 0x13d   : > { %v745_v56 = vsel %vm743_vm1, %v738_v55, %v740_v51  ;;  %v746_v57 = vsel %vm743_vm1, %v742_v50, %v738_v55 }
 0x13e   : > { %954 = vmatpush1.msra.mxu0 %v745_v56  ;;  %1025 = vmatpush1.msra.mxu1 %v746_v57 }
 0x13f   : > { %1026 = vmatprep.subr.mxu1 %v2618_v18 }
 0x140   : > { %v725_v58 = vpop.permute.xlu1 %724  ;;  %v729_v59 = vpop.permute.xlu0 %728 }
 0x141   : > { %v732_v60 = vsel %vm730_vm2, %v725_v58, %v727_v54  ;;  %v731_v61 = vsel %vm730_vm2, %v727_v54, %v729_v59  ;;  %v733_v62 = vsel %vm730_vm2, %v729_v59, %v725_v58 }
 0x142   : > { %955 = vmatprep.subr.mxu0 %v731_v61  ;;  %1027 = vmatpush1.msra.mxu1 %v733_v62 }
 0x143   : > { %956 = vmatpush1.msra.mxu0 %v732_v60  ;;  %1028 = vmatprep.subr.mxu1 %v2618_v18 }
 0x144   : > { %v711_v63 = vpop.permute.xlu1 %710  ;;  %v709_v0 = vpop.permute.xlu0 %708  ;;  %957 = vmatprep.subr.mxu0 %v2845_v46  ;;  %1029 = vmatpush1.msra.mxu1 %v2848_v47 }
 0x145   : > { %v716_v1 = vsel %vm714_vm3, %v709_v0, %v711_v63  ;;  %958 = vmatpush1.msra.mxu0 %v2855_v48  ;;  %1030 = vmatprep.subr.mxu1 %v2618_v18 }
 0x146   : > { %959 = vmatprep.subr.mxu0 %v716_v1  ;;  %v1663_v1 = vld [vmem:[%s3508_s11] sm:$0xff] }
 0x148   : > { %v696_v2 = vpop.permute.xlu1 %695  ;;  %v713_v3 = vpop.permute.xlu0 %712 }
 0x149   : > { %v715_v4 = vsel %vm714_vm3, %v711_v63, %v713_v3  ;;  %v717_v5 = vsel %vm714_vm3, %v713_v3, %v709_v0 }
 0x14a   : > { %960 = vmatpush1.msra.mxu0 %v717_v5  ;;  %1031 = vmatpush1.msra.mxu1 %v715_v4 }
 0x14b   : > { %1032 = vmatprep.subr.mxu1 %v2618_v18 }
 0x14c   : > { %v700_v46 = vpop.permute.xlu1 %699  ;;  %v698_v47 = vpop.permute.xlu0 %697 }
 0x14d   : > { %v704_v48 = vsel %vm701_vm4, %v700_v46, %v696_v2  ;;  %v702_v6 = vsel %vm701_vm4, %v698_v47, %v700_v46  ;;  %v703_v7 = vsel %vm701_vm4, %v696_v2, %v698_v47 }
 0x14e   : > { %961 = vmatprep.subr.mxu0 %v703_v7  ;;  %1033 = vmatpush1.msra.mxu1 %v702_v6 }
 0x14f   : > { %962 = vmatpush1.msra.mxu0 %v704_v48  ;;  %1034 = vmatprep.subr.mxu1 %v2618_v18 }
 0x150   : > { %v685_v11 = vpop.permute.xlu1 %684  ;;  %v683_v12 = vpop.permute.xlu0 %682 }
 0x151   : > { %v690_v13 = vsel %vm688_vm5, %v683_v12, %v685_v11 }
 0x152   : > { %963 = vmatprep.subr.mxu0 %v690_v13 }
 0x154   : > { %v668_v14 = vpop.permute.xlu1 %667  ;;  %v687_v15 = vpop.permute.xlu0 %686 }
 0x155   : > { %v689_v16 = vsel %vm688_vm5, %v685_v11, %v687_v15  ;;  %v691_v17 = vsel %vm688_vm5, %v687_v15, %v683_v12 }
 0x156   : > { %964 = vmatpush1.msra.mxu0 %v691_v17  ;;  %1035 = vmatpush1.msra.mxu1 %v689_v16 }
 0x157   : > { %1036 = vmatprep.subr.mxu1 %v2618_v18 }
 0x158   : > { %v672_v19 = vpop.permute.xlu1 %671  ;;  %v670_v23 = vpop.permute.xlu0 %669 }
 0x159   : > { %v678_v24 = vsel %vm675_vm6, %v672_v19, %v668_v14  ;;  %v676_v25 = vsel %vm675_vm6, %v670_v23, %v672_v19  ;;  %v677_v26 = vsel %vm675_vm6, %v668_v14, %v670_v23 }
 0x15a   : > { %965 = vmatprep.subr.mxu0 %v677_v26  ;;  %1037 = vmatpush1.msra.mxu1 %v676_v25 }
 0x15b   : > { %966 = vmatpush1.msra.mxu0 %v678_v24  ;;  %1066 = vmatprep.subr.mxu1 %v2618_v18 }
 0x15c   : > { %v868_v27 = vpop.permute.xlu1 %867  ;;  %v866_v28 = vpop.permute.xlu0 %865 }
 0x15d   : > { %v869_v29 = vsel %vm769_vm7, %v866_v28, %v868_v27 }
 0x15e   : > { %995 = vmatprep.subr.mxu0 %v869_v29 }
 0x160   : > { %v854_v30 = vpop.permute.xlu1 %853  ;;  %v864_v31 = vpop.permute.xlu0 %863 }
 0x161   : > { %v870_v32 = vsel %vm769_vm7, %v864_v31, %v866_v28  ;;  %v871_v35 = vsel %vm769_vm7, %v868_v27, %v864_v31 }
 0x162   : > { %996 = vmatpush2.msra.mxu0 %v870_v32  ;;  %1067 = vmatpush2.msra.mxu1 %v871_v35 }
 0x163   : > { %1068 = vmatprep.subr.mxu1 %v2618_v18 }
 0x164   : > { %v852_v36 = vpop.permute.xlu1 %851  ;;  %v856_v38 = vpop.permute.xlu0 %855 }
 0x165   : > { %v858_v40 = vsel %vm756_vm8, %v852_v36, %v854_v30  ;;  %v857_v41 = vsel %vm756_vm8, %v854_v30, %v856_v38  ;;  %v859_v42 = vsel %vm756_vm8, %v856_v38, %v852_v36 }
 0x166   : > { %997 = vmatprep.subr.mxu0 %v857_v41  ;;  %1069 = vmatpush2.msra.mxu1 %v859_v42 }
 0x167   : > { %998 = vmatpush2.msra.mxu0 %v858_v40  ;;  %1071 = vmatmul.mubr.f32.vlgmr.msra.gmra.mxu1 %v875_v39 }
 0x168   : > { %1000 = vmatmul.mubr.f32.vlgmr.msra.gmra.mxu0 %v875_v39  ;;  %2437 = vmatprep.subr.mxu1 %v2618_v18 }
 0x169   : > { %1295 = vmatprep.mubr.f32.mxu0 %v2618_v18  ;;  %2455 = vmatprep.mubr.msk.f32.mxu1 %vm2627_vm9, %v2618_v18 }
 0x171   : > { %v1081_v43 = vpop.permute.xlu0 %1080  ;;  %v1089_v50 = vpop.permute.xlu1 %1088 }
 0x227   : > { %v1072_v44 = vpop.f32.mrf.mxu1 }
 0x228   : > { %v1085_v45 = vmul.f32 %v1081_v43, %v1072_v44  ;;  %v1001_v49 = vpop.f32.mrf.mxu0 }
 0x229   : > { %v1083_v51 = vmul.f32 %v1081_v43, %v1001_v49  ;;  %v1074_v53 = vpop.f32.mrf.mxu1 }
 0x22a   : > { %v1093_v54 = vadd.f32 %v1089_v50, %v1085_v45  ;;  %v1003_v55 = vpop.f32.mrf.mxu0 }
 0x22b   : > { %v1091_v56 = vadd.f32 %v1089_v50, %v1083_v51  ;;  %v1084_v57 = vmul.f32 %v1081_v43, %v1003_v55 }
 0x22c   : > { %v1096_v58 = vmax.f32 %v1093_v54, 0.0 }
 0x22d   : > { %v1094_v59 = vmax.f32 %v1091_v56, 0.0  ;;  %v1092_v60 = vadd.f32 %v1089_v50, %v1084_v57 }
 0x22e   : > { %v1099_v61 = vmul.f32 %v1096_v58, %v2784_v22  ;;  %v1100_v58 = vld [vmem:[%s3505_s8] sm:$0xff] }
 0x22f   : > { %v3059_v62 = vmul.f32 %v1094_v59, %v2780_v20  ;;  %v1095_v63 = vmax.f32 %v1092_v60, 0.0 }
 0x230   : > { %1180 = vrot.lane.b32.xlu0 %v1099_v61, %s2626_s19  ;;  %1192 = vrot.lane.b32.xlu1 %v1099_v61, %s2625_s28 }
 0x231   : > { %v3064_v0 = vmul.f32 %v1095_v63, %v2782_v21 }
 0x234   : > { %1156 = vrot.lane.b32.xlu0 %v1099_v61, %s2620_s21  ;;  %1168 = vrot.lane.b32.xlu1 %v1099_v61, %s2619_s20 }
 0x238   : > { %1141 = vrot.lane.b32.xlu0 %v1099_v61, %s2621_s22  ;;  %1129 = vrot.lane.b32.xlu1 %v1099_v61, %s2622_s23 }
 0x23c   : > { %1176 = vrot.lane.b32.xlu1 %v3059_v62, %s2626_s19  ;;  %1188 = vrot.lane.b32.xlu0 %v3059_v62, %s2625_s28 }
 0x240   : > { %1152 = vrot.lane.b32.xlu1 %v3059_v62, %s2620_s21  ;;  %1164 = vrot.lane.b32.xlu0 %v3059_v62, %s2619_s20 }
 0x244   : > { %1125 = vrot.lane.b32.xlu1 %v3059_v62, %s2622_s23  ;;  %1137 = vrot.lane.b32.xlu0 %v3059_v62, %s2621_s22 }
 0x248   : > { %1113 = vrot.lane.b32.xlu0 %v3059_v62, %s2623_s0  ;;  %1178 = vrot.lane.b32.xlu1 %v3064_v0, %s2626_s19 }
 0x24c   : > { %1101 = vrot.lane.b32.xlu1 %v3059_v62, %s2624_s2  ;;  %1190 = vrot.lane.b32.xlu0 %v3064_v0, %s2625_s28 }
 0x250   : > { %1154 = vrot.lane.b32.xlu1 %v3064_v0, %s2620_s21  ;;  %1166 = vrot.lane.b32.xlu0 %v3064_v0, %s2619_s20 }
 0x254   : > { %1139 = vrot.lane.b32.xlu1 %v3064_v0, %s2621_s22  ;;  %1117 = vrot.lane.b32.xlu0 %v1099_v61, %s2623_s0 }
 0x258   : > { %1115 = vrot.lane.b32.xlu1 %v3064_v0, %s2623_s0  ;;  %1127 = vrot.lane.b32.xlu0 %v3064_v0, %s2622_s23 }
 0x25c   : > { %1105 = vrot.lane.b32.xlu1 %v1099_v61, %s2624_s2  ;;  %1103 = vrot.lane.b32.xlu0 %v3064_v0, %s2624_s2 }
 0x260   : > { %1666 = vperm.xlu0 %2573, %v1663_v1  }
 0x2a2   : > { %v1181_v2 = vpop.permute.xlu0 %1180  ;;  %v1193_v3 = vpop.permute.xlu1 %1192 }
 0x2a6   : > { %v1157_v4 = vpop.permute.xlu0 %1156  ;;  %v1169_v5 = vpop.permute.xlu1 %1168 }
 0x2aa   : > { %v1142_v46 = vpop.permute.xlu0 %1141  ;;  %v1130_v47 = vpop.permute.xlu1 %1129 }
 0x2ae   : > { %v1177_v48 = vpop.permute.xlu1 %1176  ;;  %v1189_v6 = vpop.permute.xlu0 %1188 }
 0x2af   : > { %v1184_v7 = vsel %vm756_vm8, %v1181_v2, %v1177_v48  ;;  %v1196_v11 = vsel %vm769_vm7, %v1193_v3, %v1189_v6 }
 0x2b0   : > { %2438 = vmatpush3.msra.mxu1 %v1196_v11 }
 0x2b1   : > { %2439 = vmatprep.subr.mxu1 %v2618_v18 }
 0x2b2   : > { %v1153_v12 = vpop.permute.xlu1 %1152  ;;  %v1165_v13 = vpop.permute.xlu0 %1164  ;;  %2440 = vmatpush3.msra.mxu1 %v1184_v7 }
 0x2b3   : > { %v1160_v14 = vsel %vm730_vm2, %v1157_v4, %v1153_v12  ;;  %v1172_v15 = vsel %vm743_vm1, %v1169_v5, %v1165_v13  ;;  %2441 = vmatprep.subr.mxu1 %v2618_v18 }
 0x2b4   : > { %2442 = vmatpush3.msra.mxu1 %v1172_v15 }
 0x2b5   : > { %2443 = vmatprep.subr.mxu1 %v2618_v18 }
 0x2b6   : > { %v1126_v16 = vpop.permute.xlu1 %1125  ;;  %v1138_v17 = vpop.permute.xlu0 %1137  ;;  %2444 = vmatpush3.msra.mxu1 %v1160_v14 }
 0x2b7   : > { %v1133_v19 = vsel %vm701_vm4, %v1130_v47, %v1126_v16  ;;  %v1145_v23 = vsel %vm714_vm3, %v1142_v46, %v1138_v17  ;;  %2445 = vmatprep.subr.mxu1 %v2618_v18 }
 0x2b8   : > { %2446 = vmatpush3.msra.mxu1 %v1099_v61 }
 0x2b9   : > { %2447 = vmatprep.subr.mxu1 %v2618_v18 }
 0x2ba   : > { %v1114_v24 = vpop.permute.xlu0 %1113  ;;  %v1179_v25 = vpop.permute.xlu1 %1178 }
 0x2bb   : > { %v1182_v26 = vsel %vm756_vm8, %v1179_v25, %v1181_v2  ;;  %v1183_v27 = vsel %vm756_vm8, %v1177_v48, %v1179_v25 }
 0x2be   : > { %v1102_v28 = vpop.permute.xlu1 %1101  ;;  %v1191_v29 = vpop.permute.xlu0 %1190 }
 0x2bf   : > { %v1194_v30 = vsel %vm769_vm7, %v1191_v29, %v1193_v3  ;;  %v1195_v31 = vsel %vm769_vm7, %v1189_v6, %v1191_v29 }
 0x2c0   : > { %1245 = vmatprep.subr.mxu0 %v1194_v30 }
 0x2c1   : > { %1246 = vmatpush1.msra.mxu0 %v1195_v31 }
 0x2c2   : > { %v1155_v32 = vpop.permute.xlu1 %1154  ;;  %v1167_v35 = vpop.permute.xlu0 %1166  ;;  %1247 = vmatprep.subr.mxu0 %v1182_v26 }
 0x2c3   : > { %v1158_v36 = vsel %vm730_vm2, %v1155_v32, %v1157_v4  ;;  %v1159_v38 = vsel %vm730_vm2, %v1153_v12, %v1155_v32  ;;  %v1170_v39 = vsel %vm743_vm1, %v1167_v35, %v1169_v5  ;;  %v1171_v40 = vsel %vm743_vm1, %v1165_v13, %v1167_v35  ;;  %1248 = vmatpush1.msra.mxu0 %v1183_v27 }
 0x2c4   : > { %1249 = vmatprep.subr.mxu0 %v1170_v39 }
 0x2c5   : > { %1250 = vmatpush1.msra.mxu0 %v1171_v40 }
 0x2c6   : > { %v1140_v41 = vpop.permute.xlu1 %1139  ;;  %v1118_v42 = vpop.permute.xlu0 %1117  ;;  %1251 = vmatprep.subr.mxu0 %v1158_v36 }
 0x2c7   : > { %v1143_v43 = vsel %vm714_vm3, %v1140_v41, %v1142_v46  ;;  %v1144_v44 = vsel %vm714_vm3, %v1138_v17, %v1140_v41  ;;  %v1121_v45 = vsel %vm688_vm5, %v1118_v42, %v1114_v24  ;;  %1252 = vmatpush1.msra.mxu0 %v1159_v38 }
 0x2c8   : > { %1253 = vmatprep.subr.mxu0 %v3064_v0  ;;  %2448 = vmatpush3.msra.mxu1 %v1143_v43 }
 0x2c9   : > { %1254 = vmatpush1.msra.mxu0 %v3059_v62  ;;  %2449 = vmatprep.subr.mxu1 %v2618_v18  ;;  %v1373_v62 = vld [vmem:[%s3507_s10] sm:$0xff] }
 0x2ca   : > { %v1116_v49 = vpop.permute.xlu1 %1115  ;;  %v1128_v50 = vpop.permute.xlu0 %1127  ;;  %1255 = vmatprep.subr.mxu0 %v1144_v44 }
 0x2cb   : > { %v1119_v51 = vsel %vm688_vm5, %v1116_v49, %v1118_v42  ;;  %v1120_v53 = vsel %vm688_vm5, %v1114_v24, %v1116_v49  ;;  %v1131_v54 = vsel %vm701_vm4, %v1128_v50, %v1130_v47  ;;  %v1132_v55 = vsel %vm701_vm4, %v1126_v16, %v1128_v50  ;;  %1256 = vmatpush1.msra.mxu0 %v1145_v23 }
 0x2cc   : > { %1257 = vmatprep.subr.mxu0 %v1132_v55  ;;  %2450 = vmatpush3.msra.mxu1 %v1131_v54 }
 0x2cd   : > { %1258 = vmatpush1.msra.mxu0 %v1133_v19  ;;  %2451 = vmatprep.subr.mxu1 %v2618_v18 }
 0x2ce   : > { %v1106_v56 = vpop.permute.xlu1 %1105  ;;  %v1104_v57 = vpop.permute.xlu0 %1103  ;;  %1259 = vmatprep.subr.mxu0 %v1120_v53  ;;  %2452 = vmatpush3.msra.mxu1 %v1119_v51 }
 0x2cf   : > { %v1109_v59 = vsel %vm675_vm6, %v1106_v56, %v1102_v28  ;;  %v1107_v60 = vsel %vm675_vm6, %v1104_v57, %v1106_v56  ;;  %v1108_v61 = vsel %vm675_vm6, %v1102_v28, %v1104_v57  ;;  %1260 = vmatpush1.msra.mxu0 %v1121_v45  ;;  %2453 = vmatprep.subr.mxu1 %v2618_v18 }
 0x2d0   : > { %1261 = vmatprep.subr.mxu0 %v1108_v61  ;;  %2454 = vmatpush3.msra.mxu1 %v1107_v60 }
 0x2d1   : > { %1262 = vmatpush1.msra.mxu0 %v1109_v59  ;;  %2456 = vmatmul.mubr.msk.f32.vlgmr.msra.gmra.mxu1 %vm1227_vm10, %v1100_v58 }
 0x2d2   : > { %2390 = vmatmul.mubr.msk.f32.vlgmr.msra.gmra.mxu0 %vm1227_vm10, %v1100_v58  ;;  %1408 = vmatprep.subr.mxu0 %v2769_v9  ;;  %v1372_v9 = vld [vmem:[%s3506_s9] sm:$0xff] }
 0x2d3   : > { %2458 = vmatprep.subr.mxu1 %v2618_v18  ;;  %1409 = vmatpush1.msra.mxu0 %v2767_v8 }
 0x2d4   : > { %2459 = vmatpush3.msra.mxu1 %v2771_v10  ;;  %2460 = vmatprep.mubr.msk.f32.mxu1 %vm2627_vm9, %v2618_v18 }
 0x2d5   : > { %1442 = vmatprep.mubr.f32.mxu0 %v2618_v18  ;;  %2461 = vmatmul.mubr.msk.f32.vlgmr.msra.gmra.mxu1 %vm1374_vm11, %v1373_v62 }
 0x2d6   : > { %2392 = vmatmul.mubr.msk.f32.vlgmr.msra.gmra.mxu0 %vm1374_vm11, %v1373_v62  ;;  %1552 = vmatprep.subr.mxu0 %v2819_v33 }
 0x2d7   : > { %1553 = vmatpush1.msra.mxu0 %v2829_v37  ;;  %2463 = vmatprep.subr.mxu1 %v2618_v18 }
 0x2d8   : > { %2464 = vmatpush3.msra.mxu1 %v2821_v34  ;;  %2465 = vmatprep.mubr.msk.f32.mxu1 %vm2627_vm9, %v2618_v18 }
 0x2d9   : > { %1586 = vmatprep.mubr.f32.mxu0 %v2618_v18  ;;  %2466 = vmatmul.mubr.msk.f32.vlgmr.msra.gmra.mxu1 %vm1374_vm11, %v1372_v9 }
 0x2da   : > { %2394 = vmatmul.mubr.msk.f32.vlgmr.msra.gmra.mxu0 %vm1374_vm11, %v1372_v9 }
 0x2db   : > { %v1667_v5 = vpop.permute.xlu0 %1666 }
 0x391   : > { %v1368_v8 = vpop.f32.mrf.mxu1 }
 0x392   : > { %v1297_v10 = vpop.f32.mrf.mxu0 }
 0x393   : > { %v2457_v33 = vpop.f32.mrf.mxu1 }
 0x394   : > { %v1299_v63 = vpop.f32.mrf.mxu0 }
 0x395   : > { %v1515_v0 = vpop.f32.mrf.mxu1 }
 0x396   : > { %v1444_v1 = vpop.f32.mrf.mxu0 }
 0x397   : > { %v2462_v37 = vpop.f32.mrf.mxu1 }
 0x398   : > { %v1446_v2 = vpop.f32.mrf.mxu0 }
 0x399   : > { %v1659_v3 = vpop.f32.mrf.mxu1 }
 0x39a   : > { %v1660_v4 = vadd.f32 %v1659_v3, %v1515_v0  ;;  %v1588_v34 = vpop.f32.mrf.mxu0 }
 0x39b   : > { %v1589_v46 = vadd.f32 %v1588_v34, %v1444_v1  ;;  %v2467_v47 = vpop.f32.mrf.mxu1 }
 0x39c   : > { %v1671_v48 = vadd.f32 %v1667_v5, %v1660_v4  ;;  %v1590_v18 = vpop.f32.mrf.mxu0 }
 0x39d   : > { %v1669_v6 = vadd.f32 %v1667_v5, %v1589_v46  ;;  %v1591_v7 = vadd.f32 %v1590_v18, %v1446_v2 }
 0x39e   : > { %v1674_v11 = vadd.f32 %v1671_v48, %v1368_v8  }
 0x39f   : > { %v1672_v12 = vadd.f32 %v1669_v6, %v1297_v10   ;;  %v1670_v13 = vadd.f32 %v1667_v5, %v1591_v7 }
 0x3a1   : > { %v1673_v14 = vadd.f32 %v1670_v13, %v1299_v63  }
 0x3a2 LB: >> { %v2628_v15 = vmov 0   ;;  %s3217_s30 = sshll.u32 %s2615_s29, 3  ;;  %v2629_v23 = vmov 0.0   ;;  %s2630_s23 = smov 109   ;;  %vm2637_vm12 = vmmov 0   ;;  %s2615_s29 = sphi %s3202_s29, %s1680_s29   ;;  %v2611_v12 = vphi %v1672_v12, %v3533_v12   ;;  %v2607_v14 = vphi %v1673_v14, %v3532_v14   ;;  %v2603_v11 = vphi %v1674_v11, %v3531_v11  }
 0x3a3   : >> { %2575 = vset.pattern.permute.xlu0 %v2628_v15  ;;  %2576 = vset.pattern.permute.xlu1 %v2628_v15  ;;  %s1685_s26 = scalar_lea.vmem %s3509_s12, %s3217_s30  ;;  %s1687_s22 = scalar_lea.vmem %s3510_s13, %s3217_s30 }
 0x3a4   : >> { %v1686_v16 = vld [vmem:[%s1685_s26] sm:$0xff]  ;;  %2468 = vmatprep.subr.mxu1 %v2629_v23  ;;  %1906 = vmatprep.mubr.f32.mxu0 %v2629_v23  ;;  %s2631_s0 = smov 110   ;;  %s3520_s2 = smov 111  }
 0x3a5   : >> { %1691 = vperm.xlu0 %2575, %v1686_v16   ;;  %v1688_v17 = vld [vmem:[%s1687_s22] sm:$0xff]  ;;  %s2633_s28 = smov 127   ;;  %s3518_s19 = smov 1   ;;  %2486 = vmatprep.mubr.msk.f32.mxu1 %vm2637_vm12, %v2629_v23 }
 0x3a6   : >> { %s3516_s1 = smov 17   ;;  %s2636_s24 = smov 18  }
 0x3a7   : >> { %s1983_s21 = scalar_lea.vmem %s3512_s15, %s3217_s30  ;;  %s2638_s22 = smov 19  }
 0x3a8   : >> { %v1984_v40 = vld [vmem:[%s1983_s21] sm:$0xff]  ;;  %s3528_s26 = smov 111   ;;  %s3529_s20 = smov 1  }
 0x3a9   : >> { %1699 = vperm.xlu0 %2575, %v1688_v17   ;;  %s3530_s21 = smov 17   ;;  %s1680_s29 = sadd.s32 1, %s2615_s29  }
 0x3aa   : >> { %p1677_p4 = scmp.ge.s32.totalorder %s1680_s29, 3  }
 0x420   : >> { %v1692_v19 = vpop.permute.xlu0 %1691 }
 0x421   : >> { %v1694_v24 = vmul.f32 %v2611_v12, %v1692_v19  ;;  %v1695_v25 = vmul.f32 %v2607_v14, %v1692_v19  ;;  %v1696_v26 = vmul.f32 %v2603_v11, %v1692_v19 }
 0x424   : >> { %v1700_v27 = vpop.permute.xlu0 %1699 }
 0x425   : >> { %v1702_v28 = vadd.f32 %v1700_v27, %v1694_v24  ;;  %v1703_v29 = vadd.f32 %v1700_v27, %v1695_v25  ;;  %v1704_v30 = vadd.f32 %v1700_v27, %v1696_v26 }
 0x427   : >> { %v1705_v31 = vmax.f32 %v1702_v28, 0.0  ;;  %v1706_v32 = vmax.f32 %v1703_v29, 0.0  ;;  %v1707_v35 = vmax.f32 %v1704_v30, 0.0 }
 0x429   : >> { %v3233_v36 = vmul.f32 %v1705_v31, %v2780_v20  ;;  %v3236_v38 = vmul.f32 %v1706_v32, %v2782_v21  ;;  %v3243_v39 = vmul.f32 %v1707_v35, %v2784_v22 }
 0x42b   : >> { %1800 = vrot.lane.b32.xlu0 %v3233_v36, %s2630_s23  ;;  %1802 = vrot.lane.b32.xlu1 %v3236_v38, %s2630_s23 }
 0x42f   : >> { %1792 = vrot.lane.b32.xlu0 %v3243_v39, %s2631_s0  ;;  %1804 = vrot.lane.b32.xlu1 %v3243_v39, %s2630_s23 }
 0x433   : >> { %1778 = vrot.lane.b32.xlu0 %v3236_v38, %s3520_s2  ;;  %1790 = vrot.lane.b32.xlu1 %v3236_v38, %s2631_s0 }
 0x437   : >> { %1776 = vrot.lane.b32.xlu0 %v3233_v36, %s3520_s2  ;;  %1788 = vrot.lane.b32.xlu1 %v3233_v36, %s2631_s0 }
 0x43b   : >> { %1768 = vrot.lane.b32.xlu0 %v3243_v39, %s2633_s28  ;;  %1780 = vrot.lane.b32.xlu1 %v3243_v39, %s3520_s2  ;;  %s1985_s2 = scalar_lea.vmem %s3513_s16, %s3217_s30 }
 0x43c   : >> { %v1986_v41 = vld [vmem:[%s1985_s2] sm:$0xff] }
 0x43f   : >> { %1749 = vrot.lane.b32.xlu0 %v3233_v36, %s3518_s19  ;;  %1766 = vrot.lane.b32.xlu1 %v3236_v38, %s2633_s28 }
 0x443   : >> { %1753 = vrot.lane.b32.xlu0 %v3243_v39, %s3518_s19  ;;  %1764 = vrot.lane.b32.xlu1 %v3233_v36, %s2633_s28 }
 0x447   : >> { %1739 = vrot.lane.b32.xlu0 %v3236_v38, %s3516_s1  ;;  %1751 = vrot.lane.b32.xlu1 %v3236_v38, %s3518_s19 }
 0x44b   : >> { %1725 = vrot.lane.b32.xlu0 %v3233_v36, %s2636_s24  ;;  %1737 = vrot.lane.b32.xlu1 %v3233_v36, %s3516_s1 }
 0x44f   : >> { %1729 = vrot.lane.b32.xlu0 %v3243_v39, %s2636_s24  ;;  %1741 = vrot.lane.b32.xlu1 %v3243_v39, %s3516_s1  ;;  %s1711_s1 = scalar_lea.vmem %s3511_s14, %s3217_s30 }
 0x450   : >> { %v1712_v29 = vld [vmem:[%s1711_s1] sm:$0xff] }
 0x453   : >> { %1715 = vrot.lane.b32.xlu0 %v3236_v38, %s2638_s22  ;;  %1727 = vrot.lane.b32.xlu1 %v3236_v38, %s2636_s24 }
 0x457   : >> { %1989 = vperm.xlu0 %2575, %v1984_v40   ;;  %1713 = vrot.lane.b32.xlu1 %v3233_v36, %s2638_s22 }
 0x45b   : >> { %1717 = vrot.lane.b32.xlu1 %v3243_v39, %s2638_s22 }
 0x45f   : >> { %1997 = vperm.xlu1 %2576, %v1986_v41  }
 0x49d   : >> { %v1801_v42 = vpop.permute.xlu0 %1800  ;;  %v1803_v43 = vpop.permute.xlu1 %1802 }
 0x49e   : >> { %v1807_v51 = vsel %vm769_vm7, %v1801_v42, %v1803_v43 }
 0x4a1   : >> { %v1793_v44 = vpop.permute.xlu0 %1792  ;;  %v1805_v45 = vpop.permute.xlu1 %1804 }
 0x4a2   : >> { %v1806_v49 = vsel %vm769_vm7, %v1803_v43, %v1805_v45  ;;  %v1808_v50 = vsel %vm769_vm7, %v1805_v45, %v1801_v42 }
 0x4a3   : >> { %1856 = vmatprep.subr.mxu0 %v1806_v49  ;;  %2469 = vmatpush3.msra.mxu1 %v1808_v50 }
 0x4a4   : >> { %1857 = vmatpush1.msra.mxu0 %v1807_v51  ;;  %2470 = vmatprep.subr.mxu1 %v2629_v23 }
 0x4a5   : >> { %v1779_v53 = vpop.permute.xlu0 %1778  ;;  %v1791_v54 = vpop.permute.xlu1 %1790 }
 0x4a6   : >> { %v1794_v55 = vsel %vm756_vm8, %v1791_v54, %v1793_v44 }
 0x4a7   : >> { %1858 = vmatprep.subr.mxu0 %v1794_v55 }
 0x4a9   : >> { %v1777_v56 = vpop.permute.xlu0 %1776  ;;  %v1789_v57 = vpop.permute.xlu1 %1788 }
 0x4aa   : >> { %v1795_v58 = vsel %vm756_vm8, %v1789_v57, %v1791_v54  ;;  %v1796_v59 = vsel %vm756_vm8, %v1793_v44, %v1789_v57  ;;  %v1783_v8 = vsel %vm743_vm1, %v1777_v56, %v1779_v53 }
 0x4ab   : >> { %1859 = vmatpush1.msra.mxu0 %v1795_v58  ;;  %2471 = vmatpush3.msra.mxu1 %v1796_v59 }
 0x4ac   : >> { %2472 = vmatprep.subr.mxu1 %v2629_v23 }
 0x4ad   : >> { %v1769_v60 = vpop.permute.xlu0 %1768  ;;  %v1781_v61 = vpop.permute.xlu1 %1780 }
 0x4ae   : >> { %v1782_v62 = vsel %vm743_vm1, %v1779_v53, %v1781_v61  ;;  %v1784_v9 = vsel %vm743_vm1, %v1781_v61, %v1777_v56 }
 0x4af   : >> { %1860 = vmatprep.subr.mxu0 %v1782_v62  ;;  %2473 = vmatpush3.msra.mxu1 %v1784_v9 }
 0x4b0   : >> { %1861 = vmatpush1.msra.mxu0 %v1783_v8  ;;  %2474 = vmatprep.subr.mxu1 %v2629_v23 }
 0x4b1   : >> { %v1750_v10 = vpop.permute.xlu0 %1749  ;;  %v1767_v33 = vpop.permute.xlu1 %1766 }
 0x4b2   : >> { %v1770_v63 = vsel %vm730_vm2, %v1767_v33, %v1769_v60 }
 0x4b3   : >> { %1862 = vmatprep.subr.mxu0 %v1770_v63 }
 0x4b5   : >> { %v1754_v0 = vpop.permute.xlu0 %1753  ;;  %v1765_v1 = vpop.permute.xlu1 %1764 }
 0x4b6   : >> { %v1771_v37 = vsel %vm730_vm2, %v1765_v1, %v1767_v33  ;;  %v1772_v2 = vsel %vm730_vm2, %v1769_v60, %v1765_v1  ;;  %v1757_v46 = vsel %vm714_vm3, %v1754_v0, %v1750_v10 }
 0x4b7   : >> { %1863 = vmatpush1.msra.mxu0 %v1771_v37  ;;  %2475 = vmatpush3.msra.mxu1 %v1772_v2 }
 0x4b8   : >> { %1864 = vmatprep.subr.mxu0 %v3236_v38  ;;  %2476 = vmatprep.subr.mxu1 %v2629_v23 }
 0x4b9   : >> { %v1740_v3 = vpop.permute.xlu0 %1739  ;;  %v1752_v4 = vpop.permute.xlu1 %1751  ;;  %1865 = vmatpush1.msra.mxu0 %v3233_v36  ;;  %2477 = vmatpush3.msra.mxu1 %v3243_v39 }
 0x4ba   : >> { %v1755_v34 = vsel %vm714_vm3, %v1752_v4, %v1754_v0  ;;  %v1756_v5 = vsel %vm714_vm3, %v1750_v10, %v1752_v4  ;;  %2478 = vmatprep.subr.mxu1 %v2629_v23 }
 0x4bb   : >> { %1866 = vmatprep.subr.mxu0 %v1756_v5  ;;  %2479 = vmatpush3.msra.mxu1 %v1755_v34 }
 0x4bc   : >> { %1867 = vmatpush1.msra.mxu0 %v1757_v46  ;;  %2480 = vmatprep.subr.mxu1 %v2629_v23 }
 0x4bd   : >> { %v1726_v47 = vpop.permute.xlu0 %1725  ;;  %v1738_v48 = vpop.permute.xlu1 %1737 }
 0x4be   : >> { %v1744_v18 = vsel %vm701_vm4, %v1738_v48, %v1740_v3 }
 0x4bf   : >> { %1868 = vmatprep.subr.mxu0 %v1744_v18 }
 0x4c1   : >> { %v1742_v6 = vpop.permute.xlu1 %1741  ;;  %v1730_v15 = vpop.permute.xlu0 %1729 }
 0x4c2   : >> { %v1743_v7 = vsel %vm701_vm4, %v1740_v3, %v1742_v6  ;;  %v1745_v13 = vsel %vm701_vm4, %v1742_v6, %v1738_v48  ;;  %v1733_v24 = vsel %vm688_vm5, %v1730_v15, %v1726_v47 }
 0x4c3   : >> { %1869 = vmatpush1.msra.mxu0 %v1745_v13  ;;  %2481 = vmatpush3.msra.mxu1 %v1743_v7 }
 0x4c4   : >> { %2482 = vmatprep.subr.mxu1 %v2629_v23 }
 0x4c5   : >> { %v1728_v16 = vpop.permute.xlu1 %1727  ;;  %v1716_v25 = vpop.permute.xlu0 %1715 }
 0x4c6   : >> { %v1731_v17 = vsel %vm688_vm5, %v1728_v16, %v1730_v15  ;;  %v1732_v19 = vsel %vm688_vm5, %v1726_v47, %v1728_v16 }
 0x4c7   : >> { %1870 = vmatprep.subr.mxu0 %v1732_v19  ;;  %2483 = vmatpush3.msra.mxu1 %v1731_v17 }
 0x4c8   : >> { %1871 = vmatpush1.msra.mxu0 %v1733_v24  ;;  %2484 = vmatprep.subr.mxu1 %v2629_v23 }
 0x4c9   : >> { %v1714_v26 = vpop.permute.xlu1 %1713 }
 0x4ca   : >> { %v1720_v27 = vsel %vm675_vm6, %v1714_v26, %v1716_v25 }
 0x4cb   : >> { %1872 = vmatprep.subr.mxu0 %v1720_v27 }
 0x4cd   : >> { %v1718_v28 = vpop.permute.xlu1 %1717 }
 0x4ce   : >> { %v1719_v30 = vsel %vm675_vm6, %v1716_v25, %v1718_v28  ;;  %v1721_v31 = vsel %vm675_vm6, %v1718_v28, %v1714_v26 }
 0x4cf   : >> { %1873 = vmatpush1.msra.mxu0 %v1721_v31  ;;  %2485 = vmatpush3.msra.mxu1 %v1719_v30 }
 0x4d0   : >> { %2397 = vmatmul.mubr.msk.f32.vlgmr.msra.gmra.mxu0 %vm1227_vm10, %v1712_v29  ;;  %2487 = vmatmul.mubr.msk.f32.vlgmr.msra.gmra.mxu1 %vm1227_vm10, %v1712_v29 }
 0x4d1   : >> { %2489 = vmatprep.subr.mxu1 %v2629_v23  ;;  %2507 = vmatprep.mubr.msk.f32.mxu1 %vm2637_vm12, %v2629_v23 }
 0x4d2   : >> { %2204 = vmatprep.mubr.f32.mxu0 %v2629_v23  ;;  %v1990_v32 = vpop.permute.xlu0 %1989 }
 0x4da   : >> { %v1998_v35 = vpop.permute.xlu1 %1997 }
 0x590   : >> { %v1908_v36 = vpop.f32.mrf.mxu0  ;;  %v1979_v38 = vpop.f32.mrf.mxu1 }
 0x591   : >> { %v1992_v39 = vmul.f32 %v1990_v32, %v1908_v36  ;;  %v1994_v40 = vmul.f32 %v1990_v32, %v1979_v38 }
 0x592   : >> { %v1910_v41 = vpop.f32.mrf.mxu0  ;;  %v2488_v42 = vpop.f32.mrf.mxu1 }
 0x593   : >> { %v1993_v43 = vmul.f32 %v1990_v32, %v1910_v41  ;;  %v2000_v44 = vadd.f32 %v1998_v35, %v1992_v39  ;;  %v2002_v45 = vadd.f32 %v1998_v35, %v1994_v40 }
 0x595   : >> { %v2001_v49 = vadd.f32 %v1998_v35, %v1993_v43  ;;  %v2003_v50 = vmax.f32 %v2000_v44, 0.0  ;;  %v2005_v51 = vmax.f32 %v2002_v45, 0.0 }
 0x597   : >> { %v2004_v53 = vmax.f32 %v2001_v49, 0.0  ;;  %v3369_v54 = vmul.f32 %v2003_v50, %v2780_v20  ;;  %v2008_v55 = vmul.f32 %v2005_v51, %v2784_v22 }
 0x599   : >> { %v3373_v56 = vmul.f32 %v2004_v53, %v2782_v21  ;;  %2090 = vrot.lane.b32.xlu0 %v2008_v55, %s2631_s0  ;;  %2102 = vrot.lane.b32.xlu1 %v2008_v55, %s2630_s23 }
 0x59d   : >> { %2066 = vrot.lane.b32.xlu0 %v2008_v55, %s2633_s28  ;;  %2078 = vrot.lane.b32.xlu1 %v2008_v55, %s3528_s26 }
 0x5a1   : >> { %2051 = vrot.lane.b32.xlu0 %v2008_v55, %s3529_s20  ;;  %2039 = vrot.lane.b32.xlu1 %v2008_v55, %s3530_s21 }
 0x5a5   : >> { %2098 = vrot.lane.b32.xlu0 %v3369_v54, %s2630_s23  ;;  %2086 = vrot.lane.b32.xlu1 %v3369_v54, %s2631_s0 }
 0x5a9   : >> { %2074 = vrot.lane.b32.xlu0 %v3369_v54, %s3528_s26  ;;  %2062 = vrot.lane.b32.xlu1 %v3369_v54, %s2633_s28 }
 0x5ad   : >> { %2047 = vrot.lane.b32.xlu0 %v3369_v54, %s3529_s20  ;;  %2035 = vrot.lane.b32.xlu1 %v3369_v54, %s3530_s21 }
 0x5b1   : >> { %2023 = vrot.lane.b32.xlu0 %v3369_v54, %s2636_s24  ;;  %2088 = vrot.lane.b32.xlu1 %v3373_v56, %s2631_s0 }
 0x5b5   : >> { %2100 = vrot.lane.b32.xlu0 %v3373_v56, %s2630_s23  ;;  %2011 = vrot.lane.b32.xlu1 %v3369_v54, %s2638_s22 }
 0x5b9   : >> { %2076 = vrot.lane.b32.xlu0 %v3373_v56, %s3528_s26  ;;  %2064 = vrot.lane.b32.xlu1 %v3373_v56, %s2633_s28  ;;  %s2009_s28 = scalar_lea.vmem %s3514_s17, %s3217_s30 }
 0x5ba   : >> { %v2010_v42 = vld [vmem:[%s2009_s28] sm:$0xff] }
 0x5bd   : >> { %2027 = vrot.lane.b32.xlu0 %v2008_v55, %s2636_s24  ;;  %2049 = vrot.lane.b32.xlu1 %v3373_v56, %s3529_s20 }
 0x5c1   : >> { %2037 = vrot.lane.b32.xlu0 %v3373_v56, %s3530_s21  ;;  %2025 = vrot.lane.b32.xlu1 %v3373_v56, %s2636_s24 }
 0x5c5   : >> { %2013 = vrot.lane.b32.xlu0 %v3373_v56, %s2638_s22  ;;  %2015 = vrot.lane.b32.xlu1 %v2008_v55, %s2638_s22 }
 0x60b   : >> { %v2091_v57 = vpop.permute.xlu0 %2090  ;;  %v2103_v58 = vpop.permute.xlu1 %2102 }
 0x60f   : >> { %v2067_v59 = vpop.permute.xlu0 %2066  ;;  %v2079_v60 = vpop.permute.xlu1 %2078 }
 0x613   : >> { %v2052_v61 = vpop.permute.xlu0 %2051  ;;  %v2040_v62 = vpop.permute.xlu1 %2039 }
 0x617   : >> { %v2099_v9 = vpop.permute.xlu0 %2098  ;;  %v2087_v8 = vpop.permute.xlu1 %2086 }
 0x618   : >> { %v2106_v10 = vsel %vm769_vm7, %v2103_v58, %v2099_v9  ;;  %v2094_v33 = vsel %vm756_vm8, %v2091_v57, %v2087_v8 }
 0x619   : >> { %2490 = vmatpush3.msra.mxu1 %v2106_v10 }
 0x61a   : >> { %2491 = vmatprep.subr.mxu1 %v2629_v23 }
 0x61b   : >> { %v2075_v63 = vpop.permute.xlu0 %2074  ;;  %v2063_v0 = vpop.permute.xlu1 %2062  ;;  %2492 = vmatpush3.msra.mxu1 %v2094_v33 }
 0x61c   : >> { %v2082_v1 = vsel %vm743_vm1, %v2079_v60, %v2075_v63  ;;  %v2070_v37 = vsel %vm730_vm2, %v2067_v59, %v2063_v0  ;;  %2493 = vmatprep.subr.mxu1 %v2629_v23 }
 0x61d   : >> { %2494 = vmatpush3.msra.mxu1 %v2082_v1 }
 0x61e   : >> { %2495 = vmatprep.subr.mxu1 %v2629_v23 }
 0x61f   : >> { %v2048_v2 = vpop.permute.xlu0 %2047  ;;  %v2036_v3 = vpop.permute.xlu1 %2035  ;;  %2496 = vmatpush3.msra.mxu1 %v2070_v37 }
 0x620   : >> { %v2055_v4 = vsel %vm714_vm3, %v2052_v61, %v2048_v2  ;;  %v2043_v34 = vsel %vm701_vm4, %v2040_v62, %v2036_v3  ;;  %2497 = vmatprep.subr.mxu1 %v2629_v23 }
 0x621   : >> { %2498 = vmatpush3.msra.mxu1 %v2008_v55 }
 0x622   : >> { %2499 = vmatprep.subr.mxu1 %v2629_v23 }
 0x623   : >> { %v2024_v5 = vpop.permute.xlu0 %2023  ;;  %v2089_v46 = vpop.permute.xlu1 %2088 }
 0x624   : >> { %v2092_v47 = vsel %vm756_vm8, %v2089_v46, %v2091_v57  ;;  %v2093_v48 = vsel %vm756_vm8, %v2087_v8, %v2089_v46 }
 0x627   : >> { %v2101_v18 = vpop.permute.xlu0 %2100  ;;  %v2012_v6 = vpop.permute.xlu1 %2011 }
 0x628   : >> { %v2104_v7 = vsel %vm769_vm7, %v2101_v18, %v2103_v58  ;;  %v2105_v13 = vsel %vm769_vm7, %v2099_v9, %v2101_v18 }
 0x629   : >> { %2154 = vmatprep.subr.mxu0 %v2104_v7 }
 0x62a   : >> { %2155 = vmatpush1.msra.mxu0 %v2105_v13 }
 0x62b   : >> { %v2077_v15 = vpop.permute.xlu0 %2076  ;;  %v2065_v16 = vpop.permute.xlu1 %2064  ;;  %2156 = vmatprep.subr.mxu0 %v2092_v47 }
 0x62c   : >> { %v2080_v17 = vsel %vm743_vm1, %v2077_v15, %v2079_v60  ;;  %v2081_v19 = vsel %vm743_vm1, %v2075_v63, %v2077_v15  ;;  %v2068_v24 = vsel %vm730_vm2, %v2065_v16, %v2067_v59  ;;  %v2069_v25 = vsel %vm730_vm2, %v2063_v0, %v2065_v16  ;;  %2157 = vmatpush1.msra.mxu0 %v2093_v48 }
 0x62d   : >> { %2158 = vmatprep.subr.mxu0 %v2080_v17 }
 0x62e   : >> { %2159 = vmatpush1.msra.mxu0 %v2081_v19 }
 0x62f   : >> { %v2028_v26 = vpop.permute.xlu0 %2027  ;;  %v2050_v27 = vpop.permute.xlu1 %2049  ;;  %2160 = vmatprep.subr.mxu0 %v2068_v24 }
 0x630   : >> { %v2031_v28 = vsel %vm688_vm5, %v2028_v26, %v2024_v5  ;;  %v2053_v29 = vsel %vm714_vm3, %v2050_v27, %v2052_v61  ;;  %v2054_v30 = vsel %vm714_vm3, %v2048_v2, %v2050_v27  ;;  %2161 = vmatpush1.msra.mxu0 %v2069_v25 }
 0x631   : >> { %2162 = vmatprep.subr.mxu0 %v3373_v56  ;;  %2500 = vmatpush3.msra.mxu1 %v2053_v29 }
 0x632   : >> { %2163 = vmatpush1.msra.mxu0 %v3369_v54  ;;  %2501 = vmatprep.subr.mxu1 %v2629_v23 }
 0x633   : >> { %v2038_v31 = vpop.permute.xlu0 %2037  ;;  %v2026_v32 = vpop.permute.xlu1 %2025  ;;  %2164 = vmatprep.subr.mxu0 %v2054_v30 }
 0x634   : >> { %v2041_v35 = vsel %vm701_vm4, %v2038_v31, %v2040_v62  ;;  %v2042_v36 = vsel %vm701_vm4, %v2036_v3, %v2038_v31  ;;  %v2029_v38 = vsel %vm688_vm5, %v2026_v32, %v2028_v26  ;;  %v2030_v39 = vsel %vm688_vm5, %v2024_v5, %v2026_v32  ;;  %2165 = vmatpush1.msra.mxu0 %v2055_v4 }
 0x635   : >> { %2166 = vmatprep.subr.mxu0 %v2042_v36  ;;  %2502 = vmatpush3.msra.mxu1 %v2041_v35 }
 0x636   : >> { %2167 = vmatpush1.msra.mxu0 %v2043_v34  ;;  %2503 = vmatprep.subr.mxu1 %v2629_v23 }
 0x637   : >> { %v2014_v40 = vpop.permute.xlu0 %2013  ;;  %v2016_v41 = vpop.permute.xlu1 %2015  ;;  %2168 = vmatprep.subr.mxu0 %v2030_v39  ;;  %2504 = vmatpush3.msra.mxu1 %v2029_v38 }
 0x638   : >> { %v2018_v43 = vsel %vm675_vm6, %v2012_v6, %v2014_v40  ;;  %v2017_v44 = vsel %vm675_vm6, %v2014_v40, %v2016_v41  ;;  %v2019_v45 = vsel %vm675_vm6, %v2016_v41, %v2012_v6  ;;  %2169 = vmatpush1.msra.mxu0 %v2031_v28  ;;  %2505 = vmatprep.subr.mxu1 %v2629_v23 }
 0x639   : >> { %2170 = vmatprep.subr.mxu0 %v2018_v43  ;;  %2506 = vmatpush3.msra.mxu1 %v2017_v44 }
 0x63a   : >> { %2171 = vmatpush1.msra.mxu0 %v2019_v45  ;;  %2508 = vmatmul.mubr.msk.f32.vlgmr.msra.gmra.mxu1 %vm1227_vm10, %v2010_v42 }
 0x63b   : >> { %2399 = vmatmul.mubr.msk.f32.vlgmr.msra.gmra.mxu0 %vm1227_vm10, %v2010_v42 }
 0x6fa   : >> { %v2277_v49 = vpop.f32.mrf.mxu1 }
 0x6fb   : >> { %v2283_v50 = vadd.f32 %v2603_v11, %v2277_v49   ;;  %v2206_v51 = vpop.f32.mrf.mxu0 }
 0x6fc   : >> { %v2281_v53 = vadd.f32 %v2611_v12, %v2206_v51   ;;  %v2509_v54 = vpop.f32.mrf.mxu1  ;;  %1679 = sbr.rel (!%p1677_p4) target bundleno = 930 (0x3a2), region = 138 }
 0x6fd   : >> { %v2208_v55 = vpop.f32.mrf.mxu0  ;;  %v3531_v11 = vmov %v2283_v50  ;;  %2286 = vst [vmem:[%s2760_s25 + $0x10] sm:$0xff] (%p1677_p4), %v2283_v50 }
 0x6fe   : >> { %v2282_v56 = vadd.f32 %v2607_v14, %v2208_v55   ;;  %v3533_v12 = vmov %v2281_v53  ;;  %2284 = vst [vmem:[%s2760_s25] sm:$0xff] (%p1677_p4), %v2281_v53 }
 0x700   : >> { %v3532_v14 = vmov %v2282_v56  ;;  %2285 = vst [vmem:[%s2760_s25 + $0x8] sm:$0xff] (%p1677_p4), %v2282_v56 }
 0x701 PF: > { %s28_s27 = sadd.s32 1, %s2599_s27  }
 0x702   : > { %p25_p5 = scmp.ge.s32.totalorder %s28_s27, 4  }
 0x704   :  { %27 = sbr.rel (!%p25_p5) target bundleno = 4 (0x4), region = 149 }

</bundles_post_ra>
